<compile_context>
chip_gen: v7x
topology: tpu7x:2x2x1
jax: 0.10.0
libtpu: 0.0.40
codegen_flags: <defaults>
</compile_context>

<pallas_src>
import functools

import jax
import jax.numpy as jnp
from jax.experimental import pallas as pl
from jax.experimental.pallas import tpu as pltpu


_VMEM_LIMIT_BYTES = 32 * 1024 * 1024  # safe on v5e/v6e/v7x, leaves headroom on v7x

_PARAMS_1D = pltpu.CompilerParams(
    dimension_semantics=("parallel",),
    vmem_limit_bytes=_VMEM_LIMIT_BYTES,
)
_PARAMS_3D = pltpu.CompilerParams(
    dimension_semantics=("parallel", "parallel", "arbitrary"),
    vmem_limit_bytes=_VMEM_LIMIT_BYTES,
)


def _pick_tile(dim, target, align):
    """Largest aligned divisor of `dim` that is <= target; else the full dim."""
    if dim <= target:
        return dim
    t = (target // align) * align
    while t >= align:
        if dim % t == 0:
            return t
        t -= align
    return dim


# ----------------------------------------------------------------------------
# Pallas kernels
# ----------------------------------------------------------------------------

def _linear_kernel(x_ref, w_ref, b_ref, o_ref, acc_ref):
    """Tiled (tm,tk)x(tk,tn) matmul with f32 accumulator over the K grid axis."""
    @pl.when(pl.program_id(2) == 0)
    def _():
        acc_ref[...] = jnp.zeros_like(acc_ref)

    acc_ref[...] += jnp.dot(
        x_ref[...].astype(jnp.bfloat16),
        w_ref[...].astype(jnp.bfloat16),
        preferred_element_type=jnp.float32,
    )

    @pl.when(pl.program_id(2) == pl.num_programs(2) - 1)
    def _():
        o_ref[...] = (acc_ref[...] + b_ref[...]).astype(o_ref.dtype)


def _ffn_kernel(x_ref, w1_ref, b1_ref, w2_ref, b2_ref, o_ref):
    """Fused Linear -> ReLU -> Linear (one launch per M tile)."""
    h = jnp.dot(
        x_ref[...].astype(jnp.bfloat16),
        w1_ref[...].astype(jnp.bfloat16),
        preferred_element_type=jnp.float32,
    ) + b1_ref[...]
    h = jnp.maximum(h, 0.0)
    o_ref[...] = (jnp.dot(
        h.astype(jnp.bfloat16),
        w2_ref[...].astype(jnp.bfloat16),
        preferred_element_type=jnp.float32,
    ) + b2_ref[...]).astype(o_ref.dtype)


def _add_layernorm_kernel(x_ref, r_ref, g_ref, b_ref, o_ref, *, eps):
    """Fused residual-add + LayerNorm (f32 elementwise math)."""
    x = x_ref[...].astype(jnp.float32) + r_ref[...].astype(jnp.float32)
    mu = jnp.mean(x, axis=-1, keepdims=True)
    var = jnp.mean((x - mu) ** 2, axis=-1, keepdims=True)
    y = (x - mu) * jax.lax.rsqrt(var + eps)
    o_ref[...] = (y * g_ref[...] + b_ref[...]).astype(o_ref.dtype)


def _attention_kernel(q_ref, k_ref, v_ref, m_ref, o_ref, *,
                      num_heads, head_dim, scale):
    """All heads of one batch element per grid step.

    q_ref: (1, Sq, H*Dh), k_ref/v_ref: (1, Skv, H*Dh),
    m_ref: (1, 1, Skv) key-padding or (1, Sq, Skv) full mask (1=keep, 0=mask).
    """
    q = q_ref[0]                     # (Sq, H*Dh) f32
    k = k_ref[0]                     # (Skv, H*Dh)
    v = v_ref[0]
    keep = m_ref[0] > 0.5            # (1, Skv) or (Sq, Skv); broadcasts over rows
    neg = jnp.float32(-1e9)

    outs = []
    # TODO(synk): for long sequences this whole-(Sq,Skv) softmax should become a
    # flash-style KV-tiled online softmax; fine at these sizes.
    for h in range(num_heads):
        lo = h * head_dim
        qh = q[:, lo:lo + head_dim].astype(jnp.bfloat16)
        kh = k[:, lo:lo + head_dim].astype(jnp.bfloat16)
        vh = v[:, lo:lo + head_dim].astype(jnp.bfloat16)

        # Contract the last dim of both (no in-kernel k.T / relayout).
        s = jax.lax.dot_general(
            qh, kh, (((1,), (1,)), ((), ())),
            preferred_element_type=jnp.float32) * scale
        s = jnp.where(keep, s, neg)
        s = s - jnp.max(s, axis=-1, keepdims=True)
        p = jnp.exp(s)
        p = p * pl.reciprocal(jnp.sum(p, axis=-1, keepdims=True), approx=True)
        outs.append(jnp.dot(p.astype(jnp.bfloat16), vh,
                            preferred_element_type=jnp.float32))

    # Single lane-dense store of all heads.
    o_ref[0] = jnp.concatenate(outs, axis=-1).astype(o_ref.dtype)


# ----------------------------------------------------------------------------
# Pallas wrappers
# ----------------------------------------------------------------------------

def pallas_linear(x2d, w, b, *, tm_target=256, tn_target=256, tk_target=512):
    """x2d: (M, K), w: (K, N), b: (1, N) -> (M, N) f32."""
    M, K = x2d.shape
    N = w.shape[1]
    tm = _pick_tile(M, tm_target, 8)
    tk = _pick_tile(K, tk_target, 128)
    tn = _pick_tile(N, tn_target, 128)
    grid = (M // tm, N // tn, K // tk)
    return pl.pallas_call(
        _linear_kernel,
        out_shape=jax.ShapeDtypeStruct((M, N), jnp.float32),
        grid=grid,
        in_specs=[
            pl.BlockSpec((tm, tk), lambda i, j, k: (i, k)),
            pl.BlockSpec((tk, tn), lambda i, j, k: (k, j)),
            pl.BlockSpec((1, tn), lambda i, j, k: (0, j)),
        ],
        out_specs=pl.BlockSpec((tm, tn), lambda i, j, k: (i, j)),
        scratch_shapes=[pltpu.VMEM((tm, tn), jnp.float32)],
        compiler_params=_PARAMS_3D,
    )(x2d, w, b)


def pallas_ffn(x2d, w1, b1, w2, b2, *, tm_target=256):
    """Fused FFN. x2d: (M, D), w1: (D, H), w2: (H, D) -> (M, D)."""
    M, D = x2d.shape
    Hd = w1.shape[1]
    tm = _pick_tile(M, tm_target, 8)
    return pl.pallas_call(
        _ffn_kernel,
        out_shape=jax.ShapeDtypeStruct((M, D), jnp.float32),
        grid=(M // tm,),
        in_specs=[
            pl.BlockSpec((tm, D), lambda i: (i, 0)),
            pl.BlockSpec((D, Hd), lambda i: (0, 0)),
            pl.BlockSpec((1, Hd), lambda i: (0, 0)),
            pl.BlockSpec((Hd, D), lambda i: (0, 0)),
            pl.BlockSpec((1, D), lambda i: (0, 0)),
        ],
        out_specs=pl.BlockSpec((tm, D), lambda i: (i, 0)),
        compiler_params=_PARAMS_1D,
    )(x2d, w1, b1, w2, b2)


def pallas_add_layernorm(x2d, r2d, gamma, beta, *, tm_target=512, eps=1e-5):
    """Fused (x + r) -> LayerNorm. x2d/r2d: (M, D), gamma/beta: (1, D)."""
    M, D = x2d.shape
    tm = _pick_tile(M, tm_target, 8)
    kernel = functools.partial(_add_layernorm_kernel, eps=eps)
    return pl.pallas_call(
        kernel,
        out_shape=jax.ShapeDtypeStruct((M, D), jnp.float32),
        grid=(M // tm,),
        in_specs=[
            pl.BlockSpec((tm, D), lambda i: (i, 0)),
            pl.BlockSpec((tm, D), lambda i: (i, 0)),
            pl.BlockSpec((1, D), lambda i: (0, 0)),
            pl.BlockSpec((1, D), lambda i: (0, 0)),
        ],
        out_specs=pl.BlockSpec((tm, D), lambda i: (i, 0)),
        compiler_params=_PARAMS_1D,
    )(x2d, r2d, gamma, beta)


def pallas_attention(q, k, v, mask, num_heads, head_dim):
    """q: (B, Sq, H*Dh), k/v: (B, Skv, H*Dh),
    mask: (B, 1, Skv) or (B, Sq, Skv) with 1=keep, 0=mask -> (B, Sq, H*Dh)."""
    B, Sq, Dqkv = q.shape
    Skv = k.shape[1]
    Mq, Mkv = mask.shape[1], mask.shape[2]
    scale = 1.0 / float(head_dim) ** 0.5
    kernel = functools.partial(
        _attention_kernel, num_heads=num_heads, head_dim=head_dim, scale=scale)
    return pl.pallas_call(
        kernel,
        out_shape=jax.ShapeDtypeStruct((B, Sq, Dqkv), jnp.float32),
        grid=(B,),
        in_specs=[
            pl.BlockSpec((1, Sq, Dqkv), lambda b: (b, 0, 0)),
            pl.BlockSpec((1, Skv, Dqkv), lambda b: (b, 0, 0)),
            pl.BlockSpec((1, Skv, Dqkv), lambda b: (b, 0, 0)),
            pl.BlockSpec((1, Mq, Mkv), lambda b: (b, 0, 0)),
        ],
        out_specs=pl.BlockSpec((1, Sq, Dqkv), lambda b: (b, 0, 0)),
        compiler_params=_PARAMS_1D,
    )(q, k, v, mask)


# ----------------------------------------------------------------------------
# Model pieces (glue in plain JAX; heavy compute in the kernels above)
# ----------------------------------------------------------------------------

def self_attention_block(x, mask, p, num_heads, attn_dim):
    """Fused QKV projection + per-batch all-head attention + output proj."""
    B, S, D = x.shape
    Dqkv = num_heads * attn_dim
    qkv = pallas_linear(x.reshape(B * S, D), p["wqkv"], p["bqkv"])
    qkv = qkv.reshape(B, S, 3 * Dqkv)
    q = qkv[..., :Dqkv]
    k = qkv[..., Dqkv:2 * Dqkv]
    v = qkv[..., 2 * Dqkv:]
    ctx = pallas_attention(q, k, v, mask, num_heads, attn_dim)   # (B, S, Dqkv)
    out = pallas_linear(ctx.reshape(B * S, Dqkv), p["wo"], p["bo"])
    return out.reshape(B, S, D)


def cross_attention_block(x_q, x_kv, mask, p, num_heads, attn_dim):
    """Q projection on the target, fused KV projection on the memory."""
    B, Sq, D = x_q.shape
    Skv = x_kv.shape[1]
    Dqkv = num_heads * attn_dim
    q = pallas_linear(x_q.reshape(B * Sq, D), p["wq"], p["bq"]).reshape(B, Sq, Dqkv)
    kv = pallas_linear(x_kv.reshape(B * Skv, D), p["wkv"], p["bkv"])
    kv = kv.reshape(B, Skv, 2 * Dqkv)
    k = kv[..., :Dqkv]
    v = kv[..., Dqkv:]
    ctx = pallas_attention(q, k, v, mask, num_heads, attn_dim)
    out = pallas_linear(ctx.reshape(B * Sq, Dqkv), p["wo"], p["bo"])
    return out.reshape(B, Sq, D)


def add_layernorm(x, r, gamma, beta):
    B, S, D = x.shape
    y = pallas_add_layernorm(x.reshape(B * S, D), r.reshape(B * S, D), gamma, beta)
    return y.reshape(B, S, D)


def feed_forward(x, p):
    B, S, D = x.shape
    y = pallas_ffn(x.reshape(B * S, D), p["w1"], p["b1"], p["w2"], p["b2"])
    return y.reshape(B, S, D)


def encoder_layer(x, src_key_mask, p, num_heads, attn_dim):
    a = self_attention_block(x, src_key_mask, p["attn"], num_heads, attn_dim)
    x = add_layernorm(x, a, p["ln1_g"], p["ln1_b"])
    f = feed_forward(x, p["ffn"])
    x = add_layernorm(x, f, p["ln2_g"], p["ln2_b"])
    return x


def decoder_layer(y, enc_out, src_key_mask, y_mask, p, num_heads, attn_dim):
    sa = self_attention_block(y, y_mask, p["self_attn"], num_heads, attn_dim)
    y = add_layernorm(y, sa, p["ln1_g"], p["ln1_b"])
    ca = cross_attention_block(y, enc_out, src_key_mask, p["cross_attn"],
                               num_heads, attn_dim)
    y = add_layernorm(y, ca, p["ln2_g"], p["ln2_b"])
    f = feed_forward(y, p["ffn"])
    y = add_layernorm(y, f, p["ln3_g"], p["ln3_b"])
    return y


def sinusoidal_pos_encoding(max_seq_len, dim):
    pos = jnp.arange(max_seq_len, dtype=jnp.float32)[:, None]
    i = jnp.arange(0, dim, 2, dtype=jnp.float32)[None, :]
    angle = pos / jnp.power(10000.0, i / float(dim))
    pe = jnp.zeros((max_seq_len, dim), jnp.float32)
    pe = pe.at[:, 0::2].set(jnp.sin(angle))
    pe = pe.at[:, 1::2].set(jnp.cos(angle))
    return pe


def transformer_forward(params, x_tokens, y, src_mask, y_mask,
                        num_heads, attn_dim):
    """x_tokens: (B, S) int32, y: (B, T, D) float32,
       src_mask: (B, S) {0,1} (1 = attend), y_mask: (B, T, T) {0,1}."""
    B, S = x_tokens.shape

    # Embedding + positional encoding (gather/add glue left to XLA).
    # TODO(synk): embedding gather has no clean small-scale Pallas win; kept in XLA.
    x = jnp.take(params["embed"], x_tokens, axis=0)          # (B, S, D)
    x = x + params["pos_enc"][None, :S, :]

    # Key-padding mask stays un-broadcast: (B, 1, S); broadcast happens in-kernel.
    src_key_mask = src_mask[:, None, :].astype(jnp.float32)
    y_mask = y_mask.astype(jnp.float32)

    for p in params["encoders"]:
        x = encoder_layer(x, src_key_mask, p, num_heads, attn_dim)

    for p in params["decoders"]:
        y = decoder_layer(y, x, src_key_mask, y_mask, p, num_heads, attn_dim)

    B, T, D = y.shape
    logits = pallas_linear(y.reshape(B * T, D), params["fc_w"], params["fc_b"])
    return logits.reshape(B, T, params["fc_w"].shape[1])


# ----------------------------------------------------------------------------
# Deterministic parameter init
# ----------------------------------------------------------------------------

def init_params(key, vocab_size, max_seq_len, depth, num_heads,
                input_dim, attn_dim, hidden_dim):
    keys = iter(jax.random.split(key, 4096))
    Dqkv = num_heads * attn_dim

    def dense(in_d, out_d):
        w = jax.random.normal(next(keys), (in_d, out_d), jnp.float32) * 0.02
        b = jnp.zeros((1, out_d), jnp.float32)
        return w, b

    def self_attn_params():
        wqkv, bqkv = dense(input_dim, 3 * Dqkv)     # fused q|k|v
        wo, bo = dense(Dqkv, input_dim)
        return dict(wqkv=wqkv, bqkv=bqkv, wo=wo, bo=bo)

    def cross_attn_params():
        wq, bq = dense(input_dim, Dqkv)
        wkv, bkv = dense(input_dim, 2 * Dqkv)       # fused k|v
        wo, bo = dense(Dqkv, input_dim)
        return dict(wq=wq, bq=bq, wkv=wkv, bkv=bkv, wo=wo, bo=bo)

    def ffn_params():
        w1, b1 = dense(input_dim, hidden_dim)
        w2, b2 = dense(hidden_dim, input_dim)
        return dict(w1=w1, b1=b1, w2=w2, b2=b2)

    def ln_params():
        return (jnp.ones((1, input_dim), jnp.float32),
                jnp.zeros((1, input_dim), jnp.float32))

    encoders = []
    for _ in range(depth):
        g1, b1 = ln_params()
        g2, b2 = ln_params()
        encoders.append(dict(attn=self_attn_params(), ffn=ffn_params(),
                             ln1_g=g1, ln1_b=b1, ln2_g=g2, ln2_b=b2))

    decoders = []
    for _ in range(depth):
        g1, b1 = ln_params()
        g2, b2 = ln_params()
        g3, b3 = ln_params()
        decoders.append(dict(self_attn=self_attn_params(),
                             cross_attn=cross_attn_params(),
                             ffn=ffn_params(),
                             ln1_g=g1, ln1_b=b1, ln2_g=g2, ln2_b=b2,
                             ln3_g=g3, ln3_b=b3))

    embed = jax.random.normal(next(keys), (vocab_size, input_dim), jnp.float32) * 0.02
    fc_w, fc_b = dense(input_dim, vocab_size)

    return dict(
        embed=embed,
        pos_enc=sinusoidal_pos_encoding(max_seq_len, input_dim),
        encoders=encoders,
        decoders=decoders,
        fc_w=fc_w,
        fc_b=fc_b,
    )


# ----------------------------------------------------------------------------
# Main
# ----------------------------------------------------------------------------

if __name__ == "__main__":
    # Small, forward-consistent shapes.
    # TODO(synk): for production, pad input_dim/attn_dim/vocab to multiples of 128
    # at the model level for fully lane-dense stores.
    vocab_size = 50
    max_seq_len = 16
    depth = 2
    num_heads = 2
    input_dim = 32
    attn_dim = 16
    hidden_dim = 64

    B, S_src, T_tgt = 2, 8, 8

    root = jax.random.PRNGKey(0)
    k_par, k_x, k_y = jax.random.split(root, 3)

    params = init_params(k_par, vocab_size, max_seq_len, depth, num_heads,
                         input_dim, attn_dim, hidden_dim)

    x_tokens = jax.random.randint(k_x, (B, S_src), 0, vocab_size, dtype=jnp.int32)
    y_emb = jax.random.normal(k_y, (B, T_tgt, input_dim), jnp.float32)

    # src_mask: key-padding mask (1 = attend, 0 = masked); mask last src token
    # of batch element 1 for variety.
    src_mask = jnp.ones((B, S_src), jnp.float32).at[1, -1].set(0.0)
    # y_mask: causal mask for decoder self-attention.
    y_mask = jnp.broadcast_to(
        jnp.tril(jnp.ones((T_tgt, T_tgt), jnp.float32))[None], (B, T_tgt, T_tgt)
    )

    fwd = jax.jit(functools.partial(transformer_forward,
                                    num_heads=num_heads, attn_dim=attn_dim))
    logits = fwd(params, x_tokens, y_emb, src_mask, y_mask)
    jax.block_until_ready(logits)

    assert logits.shape == (B, T_tgt, vocab_size)
    assert bool(jnp.all(jnp.isfinite(logits)))
    print("KERNEL_OK")
</pallas_src>

<mosaic_0001>
module attributes {stable_mosaic.version = 11 : i64} {
  func.func @_linear_kernel(%arg0: i32, %arg1: i32, %arg2: i32, %arg3: memref<16x32xf32, #tpu.memory_space<vmem>>, %arg4: memref<32x96xf32, #tpu.memory_space<vmem>>, %arg5: memref<1x96xf32, #tpu.memory_space<vmem>>, %arg6: memref<16x96xf32, #tpu.memory_space<vmem>>, %arg7: memref<16x96xf32, #tpu.memory_space<vmem>>) attributes {dimension_semantics = [#tpu.dimension_semantics<parallel>, #tpu.dimension_semantics<parallel>, #tpu.dimension_semantics<arbitrary>], iteration_bounds = array<i64: 1, 1, 1>, scalar_prefetch = 0 : i64, scratch_operands = 1 : i64, tpu.core_type = #tpu.core_type<tc>, window_params = [{transform_indices = @transform_0, window_bounds = array<i64: 16, 32>}, {transform_indices = @transform_1, window_bounds = array<i64: 32, 96>}, {transform_indices = @transform_2, window_bounds = array<i64: 1, 96>}, {transform_indices = @transform_3, window_bounds = array<i64: 16, 96>}]} {
    %c0_i32 = arith.constant 0 : i32
    %0 = arith.cmpi eq, %arg2, %c0_i32 : i32
    %1 = arith.extui %0 : i1 to i32
    %c0_i32_0 = arith.constant 0 : i32
    %2 = arith.cmpi ne, %1, %c0_i32_0 : i32
    scf.if %2 {
      %cst_10 = arith.constant 0.000000e+00 : f32
      %14 = vector.broadcast %cst_10 : f32 to vector<16x96xf32>
      %c0_11 = arith.constant 0 : index
      %c0_12 = arith.constant 0 : index
      %15 = vector.load %arg7[%c0_11, %c0_12] : memref<16x96xf32, #tpu.memory_space<vmem>>, vector<16x96xf32>
      tpu.vector_store %arg7[%c0_11, %c0_12], %14 {strides = array<i32>} : memref<16x96xf32, #tpu.memory_space<vmem>>, vector<16x96xf32>,
    } else {
    }
    %c0 = arith.constant 0 : index
    %c0_1 = arith.constant 0 : index
    %3 = vector.load %arg7[%c0, %c0_1] : memref<16x96xf32, #tpu.memory_space<vmem>>, vector<16x96xf32>
    %c0_2 = arith.constant 0 : index
    %c0_3 = arith.constant 0 : index
    %4 = vector.load %arg3[%c0_2, %c0_3] : memref<16x32xf32, #tpu.memory_space<vmem>>, vector<16x32xf32>
    %5 = arith.truncf %4 : vector<16x32xf32> to vector<16x32xbf16>
    %c0_4 = arith.constant 0 : index
    %c0_5 = arith.constant 0 : index
    %6 = vector.load %arg4[%c0_4, %c0_5] : memref<32x96xf32, #tpu.memory_space<vmem>>, vector<32x96xf32>
    %7 = arith.truncf %6 : vector<32x96xf32> to vector<32x96xbf16>
    %cst = arith.constant dense<0.000000e+00> : vector<16x96xf32>
    %8 = tpu.matmul %5, %7, %cst {dimension_numbers = #tpu.dot_dimension_numbers<[1], [0], [0], [1], [0, 0, 1, 1], [], []>} : vector<16x32xbf16>, vector<32x96xbf16>, vector<16x96xf32> -> vector<16x96xf32>
    %9 = arith.addf %3, %8 : vector<16x96xf32>
    %c0_6 = arith.constant 0 : index
    %c0_7 = arith.constant 0 : index
    %10 = vector.load %arg7[%c0_6, %c0_7] : memref<16x96xf32, #tpu.memory_space<vmem>>, vector<16x96xf32>
    tpu.vector_store %arg7[%c0_6, %c0_7], %9 {strides = array<i32>} : memref<16x96xf32, #tpu.memory_space<vmem>>, vector<16x96xf32>,
    %c0_i32_8 = arith.constant 0 : i32
    %11 = arith.cmpi eq, %arg2, %c0_i32_8 : i32
    %12 = arith.extui %11 : i1 to i32
    %c0_i32_9 = arith.constant 0 : i32
    %13 = arith.cmpi ne, %12, %c0_i32_9 : i32
    scf.if %13 {
      %c0_10 = arith.constant 0 : index
      %c0_11 = arith.constant 0 : index
      %14 = vector.load %arg7[%c0_10, %c0_11] : memref<16x96xf32, #tpu.memory_space<vmem>>, vector<16x96xf32>
      %c0_12 = arith.constant 0 : index
      %c0_13 = arith.constant 0 : index
      %15 = vector.load %arg5[%c0_12, %c0_13] : memref<1x96xf32, #tpu.memory_space<vmem>>, vector<1x96xf32>
      %16 = vector.broadcast %15 : vector<1x96xf32> to vector<16x96xf32>
      %17 = arith.addf %14, %16 : vector<16x96xf32>
      %c0_14 = arith.constant 0 : index
      %c0_15 = arith.constant 0 : index
      %18 = vector.load %arg6[%c0_14, %c0_15] : memref<16x96xf32, #tpu.memory_space<vmem>>, vector<16x96xf32>
      tpu.vector_store %arg6[%c0_14, %c0_15], %17 {strides = array<i32>} : memref<16x96xf32, #tpu.memory_space<vmem>>, vector<16x96xf32>,
    } else {
    }
    return
  }
  func.func @transform_0(%arg0: i32, %arg1: i32, %arg2: i32) -> (i32, i32) {
    %c0_i32 = arith.constant 0 : i32
    return %arg0, %arg2 : i32, i32
  }
  func.func @transform_1(%arg0: i32, %arg1: i32, %arg2: i32) -> (i32, i32) {
    %c0_i32 = arith.constant 0 : i32
    return %arg2, %arg1 : i32, i32
  }
  func.func @transform_2(%arg0: i32, %arg1: i32, %arg2: i32) -> (i32, i32) {
    %c0_i32 = arith.constant 0 : i32
    %c0_i32_0 = arith.constant 0 : i32
    return %c0_i32, %arg1 : i32, i32
  }
  func.func @transform_3(%arg0: i32, %arg1: i32, %arg2: i32) -> (i32, i32) {
    %c0_i32 = arith.constant 0 : i32
    return %arg0, %arg1 : i32, i32
  }
}

module attributes {stable_mosaic.version = 11 : i64} {
  func.func @_linear_kernel(%arg0: i32, %arg1: i32, %arg2: i32, %arg3: memref<16x32xf32, #tpu.memory_space<vmem>>, %arg4: memref<32x32xf32, #tpu.memory_space<vmem>>, %arg5: memref<1x32xf32, #tpu.memory_space<vmem>>, %arg6: memref<16x32xf32, #tpu.memory_space<vmem>>, %arg7: memref<16x32xf32, #tpu.memory_space<vmem>>) attributes {dimension_semantics = [#tpu.dimension_semantics<parallel>, #tpu.dimension_semantics<parallel>, #tpu.dimension_semantics<arbitrary>], iteration_bounds = array<i64: 1, 1, 1>, scalar_prefetch = 0 : i64, scratch_operands = 1 : i64, tpu.core_type = #tpu.core_type<tc>, window_params = [{transform_indices = @transform_0, window_bounds = array<i64: 16, 32>}, {transform_indices = @transform_1, window_bounds = array<i64: 32, 32>}, {transform_indices = @transform_2, window_bounds = array<i64: 1, 32>}, {transform_indices = @transform_3, window_bounds = array<i64: 16, 32>}]} {
    %c0_i32 = arith.constant 0 : i32
    %0 = arith.cmpi eq, %arg2, %c0_i32 : i32
    %1 = arith.extui %0 : i1 to i32
    %c0_i32_0 = arith.constant 0 : i32
    %2 = arith.cmpi ne, %1, %c0_i32_0 : i32
    scf.if %2 {
      %cst_10 = arith.constant 0.000000e+00 : f32
      %14 = vector.broadcast %cst_10 : f32 to vector<16x32xf32>
      %c0_11 = arith.constant 0 : index
      %c0_12 = arith.constant 0 : index
      %15 = vector.load %arg7[%c0_11, %c0_12] : memref<16x32xf32, #tpu.memory_space<vmem>>, vector<16x32xf32>
      tpu.vector_store %arg7[%c0_11, %c0_12], %14 {strides = array<i32>} : memref<16x32xf32, #tpu.memory_space<vmem>>, vector<16x32xf32>,
    } else {
    }
    %c0 = arith.constant 0 : index
    %c0_1 = arith.constant 0 : index
    %3 = vector.load %arg7[%c0, %c0_1] : memref<16x32xf32, #tpu.memory_space<vmem>>, vector<16x32xf32>
    %c0_2 = arith.constant 0 : index
    %c0_3 = arith.constant 0 : index
    %4 = vector.load %arg3[%c0_2, %c0_3] : memref<16x32xf32, #tpu.memory_space<vmem>>, vector<16x32xf32>
    %5 = arith.truncf %4 : vector<16x32xf32> to vector<16x32xbf16>
    %c0_4 = arith.constant 0 : index
    %c0_5 = arith.constant 0 : index
    %6 = vector.load %arg4[%c0_4, %c0_5] : memref<32x32xf32, #tpu.memory_space<vmem>>, vector<32x32xf32>
    %7 = arith.truncf %6 : vector<32x32xf32> to vector<32x32xbf16>
    %cst = arith.constant dense<0.000000e+00> : vector<16x32xf32>
    %8 = tpu.matmul %5, %7, %cst {dimension_numbers = #tpu.dot_dimension_numbers<[1], [0], [0], [1], [0, 0, 1, 1], [], []>} : vector<16x32xbf16>, vector<32x32xbf16>, vector<16x32xf32> -> vector<16x32xf32>
    %9 = arith.addf %3, %8 : vector<16x32xf32>
    %c0_6 = arith.constant 0 : index
    %c0_7 = arith.constant 0 : index
    %10 = vector.load %arg7[%c0_6, %c0_7] : memref<16x32xf32, #tpu.memory_space<vmem>>, vector<16x32xf32>
    tpu.vector_store %arg7[%c0_6, %c0_7], %9 {strides = array<i32>} : memref<16x32xf32, #tpu.memory_space<vmem>>, vector<16x32xf32>,
    %c0_i32_8 = arith.constant 0 : i32
    %11 = arith.cmpi eq, %arg2, %c0_i32_8 : i32
    %12 = arith.extui %11 : i1 to i32
    %c0_i32_9 = arith.constant 0 : i32
    %13 = arith.cmpi ne, %12, %c0_i32_9 : i32
    scf.if %13 {
      %c0_10 = arith.constant 0 : index
      %c0_11 = arith.constant 0 : index
      %14 = vector.load %arg7[%c0_10, %c0_11] : memref<16x32xf32, #tpu.memory_space<vmem>>, vector<16x32xf32>
      %c0_12 = arith.constant 0 : index
      %c0_13 = arith.constant 0 : index
      %15 = vector.load %arg5[%c0_12, %c0_13] : memref<1x32xf32, #tpu.memory_space<vmem>>, vector<1x32xf32>
      %16 = vector.broadcast %15 : vector<1x32xf32> to vector<16x32xf32>
      %17 = arith.addf %14, %16 : vector<16x32xf32>
      %c0_14 = arith.constant 0 : index
      %c0_15 = arith.constant 0 : index
      %18 = vector.load %arg6[%c0_14, %c0_15] : memref<16x32xf32, #tpu.memory_space<vmem>>, vector<16x32xf32>
      tpu.vector_store %arg6[%c0_14, %c0_15], %17 {strides = array<i32>} : memref<16x32xf32, #tpu.memory_space<vmem>>, vector<16x32xf32>,
    } else {
    }
    return
  }
  func.func @transform_0(%arg0: i32, %arg1: i32, %arg2: i32) -> (i32, i32) {
    %c0_i32 = arith.constant 0 : i32
    return %arg0, %arg2 : i32, i32
  }
  func.func @transform_1(%arg0: i32, %arg1: i32, %arg2: i32) -> (i32, i32) {
    %c0_i32 = arith.constant 0 : i32
    return %arg2, %arg1 : i32, i32
  }
  func.func @transform_2(%arg0: i32, %arg1: i32, %arg2: i32) -> (i32, i32) {
    %c0_i32 = arith.constant 0 : i32
    %c0_i32_0 = arith.constant 0 : i32
    return %c0_i32, %arg1 : i32, i32
  }
  func.func @transform_3(%arg0: i32, %arg1: i32, %arg2: i32) -> (i32, i32) {
    %c0_i32 = arith.constant 0 : i32
    return %arg0, %arg1 : i32, i32
  }
}

module attributes {stable_mosaic.version = 11 : i64} {
  func.func @_attention_kernel(%arg0: i32, %arg1: memref<1x8x32xf32, #tpu.memory_space<vmem>>, %arg2: memref<1x8x32xf32, #tpu.memory_space<vmem>>, %arg3: memref<1x8x32xf32, #tpu.memory_space<vmem>>, %arg4: memref<1x1x8xf32, #tpu.memory_space<vmem>>, %arg5: memref<1x8x32xf32, #tpu.memory_space<vmem>>) attributes {dimension_semantics = [#tpu.dimension_semantics<parallel>], iteration_bounds = array<i64: 2>, scalar_prefetch = 0 : i64, scratch_operands = 0 : i64, tpu.core_type = #tpu.core_type<tc>, window_params = [{transform_indices = @transform_0, window_bounds = array<i64: 1, 8, 32>}, {transform_indices = @transform_1, window_bounds = array<i64: 1, 8, 32>}, {transform_indices = @transform_2, window_bounds = array<i64: 1, 8, 32>}, {transform_indices = @transform_3, window_bounds = array<i64: 1, 1, 8>}, {transform_indices = @transform_4, window_bounds = array<i64: 1, 8, 32>}]} {
    %c0 = arith.constant 0 : index
    %c0_0 = arith.constant 0 : index
    %c0_1 = arith.constant 0 : index
    %0 = vector.load %arg1[%c0, %c0_0, %c0_1] : memref<1x8x32xf32, #tpu.memory_space<vmem>>, vector<1x8x32xf32>
    %1 = vector.shape_cast %0 : vector<1x8x32xf32> to vector<8x32xf32>
    %c0_2 = arith.constant 0 : index
    %c0_3 = arith.constant 0 : index
    %c0_4 = arith.constant 0 : index
    %2 = vector.load %arg2[%c0_2, %c0_3, %c0_4] : memref<1x8x32xf32, #tpu.memory_space<vmem>>, vector<1x8x32xf32>
    %3 = vector.shape_cast %2 : vector<1x8x32xf32> to vector<8x32xf32>
    %c0_5 = arith.constant 0 : index
    %c0_6 = arith.constant 0 : index
    %c0_7 = arith.constant 0 : index
    %4 = vector.load %arg3[%c0_5, %c0_6, %c0_7] : memref<1x8x32xf32, #tpu.memory_space<vmem>>, vector<1x8x32xf32>
    %5 = vector.shape_cast %4 : vector<1x8x32xf32> to vector<8x32xf32>
    %c0_8 = arith.constant 0 : index
    %c0_9 = arith.constant 0 : index
    %c0_10 = arith.constant 0 : index
    %6 = vector.load %arg4[%c0_8, %c0_9, %c0_10] : memref<1x1x8xf32, #tpu.memory_space<vmem>>, vector<1x1x8xf32>
    %7 = vector.shape_cast %6 : vector<1x1x8xf32> to vector<1x8xf32>
    %cst = arith.constant 5.000000e-01 : f32
    %8 = vector.broadcast %cst : f32 to vector<1x8xf32>
    %9 = arith.cmpf ogt, %7, %8 : vector<1x8xf32>
    %10 = vector.extract_strided_slice %1 {offsets = [0, 0], sizes = [8, 16], strides = [1, 1]} : vector<8x32xf32> to vector<8x16xf32>
    %11 = arith.truncf %10 : vector<8x16xf32> to vector<8x16xbf16>
    %12 = vector.extract_strided_slice %3 {offsets = [0, 0], sizes = [8, 16], strides = [1, 1]} : vector<8x32xf32> to vector<8x16xf32>
    %13 = arith.truncf %12 : vector<8x16xf32> to vector<8x16xbf16>
    %14 = vector.extract_strided_slice %5 {offsets = [0, 0], sizes = [8, 16], strides = [1, 1]} : vector<8x32xf32> to vector<8x16xf32>
    %15 = arith.truncf %14 : vector<8x16xf32> to vector<8x16xbf16>
    %cst_11 = arith.constant dense<0.000000e+00> : vector<8x8xf32>
    %16 = tpu.matmul %11, %13, %cst_11 {dimension_numbers = #tpu.dot_dimension_numbers<[1], [1], [0], [0], [0, 0, 1, 0], [], []>} : vector<8x16xbf16>, vector<8x16xbf16>, vector<8x8xf32> -> vector<8x8xf32>
    %cst_12 = arith.constant 2.500000e-01 : f32
    %17 = vector.broadcast %cst_12 : f32 to vector<8x8xf32>
    %18 = arith.mulf %16, %17 : vector<8x8xf32>
    %cst_13 = arith.constant -1.000000e+09 : f32
    %19 = vector.shape_cast %9 : vector<1x8xi1> to vector<1x8xi1>
    %20 = vector.broadcast %19 : vector<1x8xi1> to vector<8x8xi1>
    %21 = vector.broadcast %cst_13 : f32 to vector<8x8xf32>
    %22 = arith.select %20, %18, %21 : vector<8x8xi1>, vector<8x8xf32>
    %cst_14 = arith.constant dense<0xFF800000> : vector<8xf32>
    %23 = vector.multi_reduction <maximumf>, %22, %cst_14 [1] : vector<8x8xf32> to vector<8xf32>
    %24 = vector.shape_cast %23 : vector<8xf32> to vector<8x1xf32>
    %25 = vector.broadcast %24 : vector<8x1xf32> to vector<8x8xf32>
    %26 = arith.subf %22, %25 : vector<8x8xf32>
    %27 = math.exp %26 : vector<8x8xf32>
    %cst_15 = arith.constant dense<0.000000e+00> : vector<8xf32>
    %28 = vector.multi_reduction <add>, %27, %cst_15 [1] : vector<8x8xf32> to vector<8xf32>
    %29 = vector.shape_cast %28 : vector<8xf32> to vector<8x1xf32>
    %30 = tpu.reciprocal %29 {approx = true} : vector<8x1xf32> -> vector<8x1xf32>
    %31 = vector.broadcast %30 : vector<8x1xf32> to vector<8x8xf32>
    %32 = arith.mulf %27, %31 : vector<8x8xf32>
    %33 = arith.truncf %32 : vector<8x8xf32> to vector<8x8xbf16>
    %cst_16 = arith.constant dense<0.000000e+00> : vector<8x16xf32>
    %34 = tpu.matmul %33, %15, %cst_16 {dimension_numbers = #tpu.dot_dimension_numbers<[1], [0], [0], [1], [0, 0, 1, 1], [], []>} : vector<8x8xbf16>, vector<8x16xbf16>, vector<8x16xf32> -> vector<8x16xf32>
    %35 = vector.extract_strided_slice %1 {offsets = [0, 16], sizes = [8, 16], strides = [1, 1]} : vector<8x32xf32> to vector<8x16xf32>
    %36 = arith.truncf %35 : vector<8x16xf32> to vector<8x16xbf16>
    %37 = vector.extract_strided_slice %3 {offsets = [0, 16], sizes = [8, 16], strides = [1, 1]} : vector<8x32xf32> to vector<8x16xf32>
    %38 = arith.truncf %37 : vector<8x16xf32> to vector<8x16xbf16>
    %39 = vector.extract_strided_slice %5 {offsets = [0, 16], sizes = [8, 16], strides = [1, 1]} : vector<8x32xf32> to vector<8x16xf32>
    %40 = arith.truncf %39 : vector<8x16xf32> to vector<8x16xbf16>
    %cst_17 = arith.constant dense<0.000000e+00> : vector<8x8xf32>
    %41 = tpu.matmul %36, %38, %cst_17 {dimension_numbers = #tpu.dot_dimension_numbers<[1], [1], [0], [0], [0, 0, 1, 0], [], []>} : vector<8x16xbf16>, vector<8x16xbf16>, vector<8x8xf32> -> vector<8x8xf32>
    %cst_18 = arith.constant 2.500000e-01 : f32
    %42 = vector.broadcast %cst_18 : f32 to vector<8x8xf32>
    %43 = arith.mulf %41, %42 : vector<8x8xf32>
    %cst_19 = arith.constant -1.000000e+09 : f32
    %44 = vector.shape_cast %9 : vector<1x8xi1> to vector<1x8xi1>
    %45 = vector.broadcast %44 : vector<1x8xi1> to vector<8x8xi1>
    %46 = vector.broadcast %cst_19 : f32 to vector<8x8xf32>
    %47 = arith.select %45, %43, %46 : vector<8x8xi1>, vector<8x8xf32>
    %cst_20 = arith.constant dense<0xFF800000> : vector<8xf32>
    %48 = vector.multi_reduction <maximumf>, %47, %cst_20 [1] : vector<8x8xf32> to vector<8xf32>
    %49 = vector.shape_cast %48 : vector<8xf32> to vector<8x1xf32>
    %50 = vector.broadcast %49 : vector<8x1xf32> to vector<8x8xf32>
    %51 = arith.subf %47, %50 : vector<8x8xf32>
    %52 = math.exp %51 : vector<8x8xf32>
    %cst_21 = arith.constant dense<0.000000e+00> : vector<8xf32>
    %53 = vector.multi_reduction <add>, %52, %cst_21 [1] : vector<8x8xf32> to vector<8xf32>
    %54 = vector.shape_cast %53 : vector<8xf32> to vector<8x1xf32>
    %55 = tpu.reciprocal %54 {approx = true} : vector<8x1xf32> -> vector<8x1xf32>
    %56 = vector.broadcast %55 : vector<8x1xf32> to vector<8x8xf32>
    %57 = arith.mulf %52, %56 : vector<8x8xf32>
    %58 = arith.truncf %57 : vector<8x8xf32> to vector<8x8xbf16>
    %cst_22 = arith.constant dense<0.000000e+00> : vector<8x16xf32>
    %59 = tpu.matmul %58, %40, %cst_22 {dimension_numbers = #tpu.dot_dimension_numbers<[1], [0], [0], [1], [0, 0, 1, 1], [], []>} : vector<8x8xbf16>, vector<8x16xbf16>, vector<8x16xf32> -> vector<8x16xf32>
    %60 = tpu.concatenate %34, %59 in 1 : vector<8x16xf32>, vector<8x16xf32> -> vector<8x32xf32>
    %c0_23 = arith.constant 0 : index
    %c0_24 = arith.constant 0 : index
    %c0_25 = arith.constant 0 : index
    %61 = vector.load %arg5[%c0_23, %c0_24, %c0_25] : memref<1x8x32xf32, #tpu.memory_space<vmem>>, vector<1x8x32xf32>
    %62 = vector.shape_cast %61 : vector<1x8x32xf32> to vector<8x32xf32>
    %63 = vector.shape_cast %60 : vector<8x32xf32> to vector<1x8x32xf32>
    tpu.vector_store %arg5[%c0_23, %c0_24, %c0_25], %63 {strides = array<i32>} : memref<1x8x32xf32, #tpu.memory_space<vmem>>, vector<1x8x32xf32>,
    return
  }
  func.func @transform_0(%arg0: i32) -> (i32, i32, i32) {
    %c0_i32 = arith.constant 0 : i32
    %c0_i32_0 = arith.constant 0 : i32
    %c0_i32_1 = arith.constant 0 : i32
    return %arg0, %c0_i32, %c0_i32_0 : i32, i32, i32
  }
  func.func @transform_1(%arg0: i32) -> (i32, i32, i32) {
    %c0_i32 = arith.constant 0 : i32
    %c0_i32_0 = arith.constant 0 : i32
    %c0_i32_1 = arith.constant 0 : i32
    return %arg0, %c0_i32, %c0_i32_0 : i32, i32, i32
  }
  func.func @transform_2(%arg0: i32) -> (i32, i32, i32) {
    %c0_i32 = arith.constant 0 : i32
    %c0_i32_0 = arith.constant 0 : i32
    %c0_i32_1 = arith.constant 0 : i32
    return %arg0, %c0_i32, %c0_i32_0 : i32, i32, i32
  }
  func.func @transform_3(%arg0: i32) -> (i32, i32, i32) {
    %c0_i32 = arith.constant 0 : i32
    %c0_i32_0 = arith.constant 0 : i32
    %c0_i32_1 = arith.constant 0 : i32
    return %arg0, %c0_i32, %c0_i32_0 : i32, i32, i32
  }
  func.func @transform_4(%arg0: i32) -> (i32, i32, i32) {
    %c0_i32 = arith.constant 0 : i32
    %c0_i32_0 = arith.constant 0 : i32
    %c0_i32_1 = arith.constant 0 : i32
    return %arg0, %c0_i32, %c0_i32_0 : i32, i32, i32
  }
}

module attributes {stable_mosaic.version = 11 : i64} {
  func.func @_add_layernorm_kernel(%arg0: i32, %arg1: memref<16x32xf32, #tpu.memory_space<vmem>>, %arg2: memref<16x32xf32, #tpu.memory_space<vmem>>, %arg3: memref<1x32xf32, #tpu.memory_space<vmem>>, %arg4: memref<1x32xf32, #tpu.memory_space<vmem>>, %arg5: memref<16x32xf32, #tpu.memory_space<vmem>>) attributes {dimension_semantics = [#tpu.dimension_semantics<parallel>], iteration_bounds = array<i64: 1>, scalar_prefetch = 0 : i64, scratch_operands = 0 : i64, tpu.core_type = #tpu.core_type<tc>, window_params = [{transform_indices = @transform_0, window_bounds = array<i64: 16, 32>}, {transform_indices = @transform_1, window_bounds = array<i64: 16, 32>}, {pipeline_mode = #tpu.pipeline_mode<synchronous>, transform_indices = @transform_2, window_bounds = array<i64: 1, 32>}, {pipeline_mode = #tpu.pipeline_mode<synchronous>, transform_indices = @transform_3, window_bounds = array<i64: 1, 32>}, {transform_indices = @transform_4, window_bounds = array<i64: 16, 32>}]} {
    %c0 = arith.constant 0 : index
    %c0_0 = arith.constant 0 : index
    %0 = vector.load %arg1[%c0, %c0_0] : memref<16x32xf32, #tpu.memory_space<vmem>>, vector<16x32xf32>
    %c0_1 = arith.constant 0 : index
    %c0_2 = arith.constant 0 : index
    %1 = vector.load %arg2[%c0_1, %c0_2] : memref<16x32xf32, #tpu.memory_space<vmem>>, vector<16x32xf32>
    %2 = arith.addf %0, %1 : vector<16x32xf32>
    %cst = arith.constant dense<0.000000e+00> : vector<16xf32>
    %3 = vector.multi_reduction <add>, %2, %cst [1] : vector<16x32xf32> to vector<16xf32>
    %4 = vector.shape_cast %3 : vector<16xf32> to vector<16x1xf32>
    %cst_3 = arith.constant 3.200000e+01 : f32
    %5 = vector.broadcast %cst_3 : f32 to vector<16x1xf32>
    %6 = arith.divf %4, %5 : vector<16x1xf32>
    %7 = vector.broadcast %6 : vector<16x1xf32> to vector<16x32xf32>
    %8 = arith.subf %2, %7 : vector<16x32xf32>
    %9 = arith.mulf %8, %8 : vector<16x32xf32>
    %cst_4 = arith.constant dense<0.000000e+00> : vector<16xf32>
    %10 = vector.multi_reduction <add>, %9, %cst_4 [1] : vector<16x32xf32> to vector<16xf32>
    %11 = vector.shape_cast %10 : vector<16xf32> to vector<16x1xf32>
    %cst_5 = arith.constant 3.200000e+01 : f32
    %12 = vector.broadcast %cst_5 : f32 to vector<16x1xf32>
    %13 = arith.divf %11, %12 : vector<16x1xf32>
    %14 = vector.broadcast %6 : vector<16x1xf32> to vector<16x32xf32>
    %15 = arith.subf %2, %14 : vector<16x32xf32>
    %cst_6 = arith.constant 9.99999974E-6 : f32
    %16 = vector.broadcast %cst_6 : f32 to vector<16x1xf32>
    %17 = arith.addf %13, %16 : vector<16x1xf32>
    %18 = math.rsqrt %17 : vector<16x1xf32>
    %19 = vector.broadcast %18 : vector<16x1xf32> to vector<16x32xf32>
    %20 = arith.mulf %15, %19 : vector<16x32xf32>
    %c0_7 = arith.constant 0 : index
    %c0_8 = arith.constant 0 : index
    %21 = vector.load %arg3[%c0_7, %c0_8] : memref<1x32xf32, #tpu.memory_space<vmem>>, vector<1x32xf32>
    %22 = vector.broadcast %21 : vector<1x32xf32> to vector<16x32xf32>
    %23 = arith.mulf %20, %22 : vector<16x32xf32>
    %c0_9 = arith.constant 0 : index
    %c0_10 = arith.constant 0 : index
    %24 = vector.load %arg4[%c0_9, %c0_10] : memref<1x32xf32, #tpu.memory_space<vmem>>, vector<1x32xf32>
    %25 = vector.broadcast %24 : vector<1x32xf32> to vector<16x32xf32>
    %26 = arith.addf %23, %25 : vector<16x32xf32>
    %c0_11 = arith.constant 0 : index
    %c0_12 = arith.constant 0 : index
    %27 = vector.load %arg5[%c0_11, %c0_12] : memref<16x32xf32, #tpu.memory_space<vmem>>, vector<16x32xf32>
    tpu.vector_store %arg5[%c0_11, %c0_12], %26 {strides = array<i32>} : memref<16x32xf32, #tpu.memory_space<vmem>>, vector<16x32xf32>,
    return
  }
  func.func @transform_0(%arg0: i32) -> (i32, i32) {
    %c0_i32 = arith.constant 0 : i32
    %c0_i32_0 = arith.constant 0 : i32
    return %arg0, %c0_i32 : i32, i32
  }
  func.func @transform_1(%arg0: i32) -> (i32, i32) {
    %c0_i32 = arith.constant 0 : i32
    %c0_i32_0 = arith.constant 0 : i32
    return %arg0, %c0_i32 : i32, i32
  }
  func.func @transform_2(%arg0: i32) -> (i32, i32) {
    %c0_i32 = arith.constant 0 : i32
    %c0_i32_0 = arith.constant 0 : i32
    %c0_i32_1 = arith.constant 0 : i32
    return %c0_i32, %c0_i32_0 : i32, i32
  }
  func.func @transform_3(%arg0: i32) -> (i32, i32) {
    %c0_i32 = arith.constant 0 : i32
    %c0_i32_0 = arith.constant 0 : i32
    %c0_i32_1 = arith.constant 0 : i32
    return %c0_i32, %c0_i32_0 : i32, i32
  }
  func.func @transform_4(%arg0: i32) -> (i32, i32) {
    %c0_i32 = arith.constant 0 : i32
    %c0_i32_0 = arith.constant 0 : i32
    return %arg0, %c0_i32 : i32, i32
  }
}

module attributes {stable_mosaic.version = 11 : i64} {
  func.func @_ffn_kernel(%arg0: i32, %arg1: memref<16x32xf32, #tpu.memory_space<vmem>>, %arg2: memref<32x64xf32, #tpu.memory_space<vmem>>, %arg3: memref<1x64xf32, #tpu.memory_space<vmem>>, %arg4: memref<64x32xf32, #tpu.memory_space<vmem>>, %arg5: memref<1x32xf32, #tpu.memory_space<vmem>>, %arg6: memref<16x32xf32, #tpu.memory_space<vmem>>) attributes {dimension_semantics = [#tpu.dimension_semantics<parallel>], iteration_bounds = array<i64: 1>, scalar_prefetch = 0 : i64, scratch_operands = 0 : i64, tpu.core_type = #tpu.core_type<tc>, window_params = [{transform_indices = @transform_0, window_bounds = array<i64: 16, 32>}, {pipeline_mode = #tpu.pipeline_mode<synchronous>, transform_indices = @transform_1, window_bounds = array<i64: 32, 64>}, {pipeline_mode = #tpu.pipeline_mode<synchronous>, transform_indices = @transform_2, window_bounds = array<i64: 1, 64>}, {pipeline_mode = #tpu.pipeline_mode<synchronous>, transform_indices = @transform_3, window_bounds = array<i64: 64, 32>}, {pipeline_mode = #tpu.pipeline_mode<synchronous>, transform_indices = @transform_4, window_bounds = array<i64: 1, 32>}, {transform_indices = @transform_5, window_bounds = array<i64: 16, 32>}]} {
    %c0 = arith.constant 0 : index
    %c0_0 = arith.constant 0 : index
    %0 = vector.load %arg1[%c0, %c0_0] : memref<16x32xf32, #tpu.memory_space<vmem>>, vector<16x32xf32>
    %1 = arith.truncf %0 : vector<16x32xf32> to vector<16x32xbf16>
    %c0_1 = arith.constant 0 : index
    %c0_2 = arith.constant 0 : index
    %2 = vector.load %arg2[%c0_1, %c0_2] : memref<32x64xf32, #tpu.memory_space<vmem>>, vector<32x64xf32>
    %3 = arith.truncf %2 : vector<32x64xf32> to vector<32x64xbf16>
    %cst = arith.constant dense<0.000000e+00> : vector<16x64xf32>
    %4 = tpu.matmul %1, %3, %cst {dimension_numbers = #tpu.dot_dimension_numbers<[1], [0], [0], [1], [0, 0, 1, 1], [], []>} : vector<16x32xbf16>, vector<32x64xbf16>, vector<16x64xf32> -> vector<16x64xf32>
    %c0_3 = arith.constant 0 : index
    %c0_4 = arith.constant 0 : index
    %5 = vector.load %arg3[%c0_3, %c0_4] : memref<1x64xf32, #tpu.memory_space<vmem>>, vector<1x64xf32>
    %6 = vector.broadcast %5 : vector<1x64xf32> to vector<16x64xf32>
    %7 = arith.addf %4, %6 : vector<16x64xf32>
    %cst_5 = arith.constant 0.000000e+00 : f32
    %8 = vector.broadcast %cst_5 : f32 to vector<16x64xf32>
    %9 = arith.maximumf %7, %8 : vector<16x64xf32>
    %10 = arith.truncf %9 : vector<16x64xf32> to vector<16x64xbf16>
    %c0_6 = arith.constant 0 : index
    %c0_7 = arith.constant 0 : index
    %11 = vector.load %arg4[%c0_6, %c0_7] : memref<64x32xf32, #tpu.memory_space<vmem>>, vector<64x32xf32>
    %12 = arith.truncf %11 : vector<64x32xf32> to vector<64x32xbf16>
    %cst_8 = arith.constant dense<0.000000e+00> : vector<16x32xf32>
    %13 = tpu.matmul %10, %12, %cst_8 {dimension_numbers = #tpu.dot_dimension_numbers<[1], [0], [0], [1], [0, 0, 1, 1], [], []>} : vector<16x64xbf16>, vector<64x32xbf16>, vector<16x32xf32> -> vector<16x32xf32>
    %c0_9 = arith.constant 0 : index
    %c0_10 = arith.constant 0 : index
    %14 = vector.load %arg5[%c0_9, %c0_10] : memref<1x32xf32, #tpu.memory_space<vmem>>, vector<1x32xf32>
    %15 = vector.broadcast %14 : vector<1x32xf32> to vector<16x32xf32>
    %16 = arith.addf %13, %15 : vector<16x32xf32>
    %c0_11 = arith.constant 0 : index
    %c0_12 = arith.constant 0 : index
    %17 = vector.load %arg6[%c0_11, %c0_12] : memref<16x32xf32, #tpu.memory_space<vmem>>, vector<16x32xf32>
    tpu.vector_store %arg6[%c0_11, %c0_12], %16 {strides = array<i32>} : memref<16x32xf32, #tpu.memory_space<vmem>>, vector<16x32xf32>,
    return
  }
  func.func @transform_0(%arg0: i32) -> (i32, i32) {
    %c0_i32 = arith.constant 0 : i32
    %c0_i32_0 = arith.constant 0 : i32
    return %arg0, %c0_i32 : i32, i32
  }
  func.func @transform_1(%arg0: i32) -> (i32, i32) {
    %c0_i32 = arith.constant 0 : i32
    %c0_i32_0 = arith.constant 0 : i32
    %c0_i32_1 = arith.constant 0 : i32
    return %c0_i32, %c0_i32_0 : i32, i32
  }
  func.func @transform_2(%arg0: i32) -> (i32, i32) {
    %c0_i32 = arith.constant 0 : i32
    %c0_i32_0 = arith.constant 0 : i32
    %c0_i32_1 = arith.constant 0 : i32
    return %c0_i32, %c0_i32_0 : i32, i32
  }
  func.func @transform_3(%arg0: i32) -> (i32, i32) {
    %c0_i32 = arith.constant 0 : i32
    %c0_i32_0 = arith.constant 0 : i32
    %c0_i32_1 = arith.constant 0 : i32
    return %c0_i32, %c0_i32_0 : i32, i32
  }
  func.func @transform_4(%arg0: i32) -> (i32, i32) {
    %c0_i32 = arith.constant 0 : i32
    %c0_i32_0 = arith.constant 0 : i32
    %c0_i32_1 = arith.constant 0 : i32
    return %c0_i32, %c0_i32_0 : i32, i32
  }
  func.func @transform_5(%arg0: i32) -> (i32, i32) {
    %c0_i32 = arith.constant 0 : i32
    %c0_i32_0 = arith.constant 0 : i32
    return %arg0, %c0_i32 : i32, i32
  }
}

module attributes {stable_mosaic.version = 11 : i64} {
  func.func @_linear_kernel(%arg0: i32, %arg1: i32, %arg2: i32, %arg3: memref<16x32xf32, #tpu.memory_space<vmem>>, %arg4: memref<32x64xf32, #tpu.memory_space<vmem>>, %arg5: memref<1x64xf32, #tpu.memory_space<vmem>>, %arg6: memref<16x64xf32, #tpu.memory_space<vmem>>, %arg7: memref<16x64xf32, #tpu.memory_space<vmem>>) attributes {dimension_semantics = [#tpu.dimension_semantics<parallel>, #tpu.dimension_semantics<parallel>, #tpu.dimension_semantics<arbitrary>], iteration_bounds = array<i64: 1, 1, 1>, scalar_prefetch = 0 : i64, scratch_operands = 1 : i64, tpu.core_type = #tpu.core_type<tc>, window_params = [{transform_indices = @transform_0, window_bounds = array<i64: 16, 32>}, {transform_indices = @transform_1, window_bounds = array<i64: 32, 64>}, {transform_indices = @transform_2, window_bounds = array<i64: 1, 64>}, {transform_indices = @transform_3, window_bounds = array<i64: 16, 64>}]} {
    %c0_i32 = arith.constant 0 : i32
    %0 = arith.cmpi eq, %arg2, %c0_i32 : i32
    %1 = arith.extui %0 : i1 to i32
    %c0_i32_0 = arith.constant 0 : i32
    %2 = arith.cmpi ne, %1, %c0_i32_0 : i32
    scf.if %2 {
      %cst_10 = arith.constant 0.000000e+00 : f32
      %14 = vector.broadcast %cst_10 : f32 to vector<16x64xf32>
      %c0_11 = arith.constant 0 : index
      %c0_12 = arith.constant 0 : index
      %15 = vector.load %arg7[%c0_11, %c0_12] : memref<16x64xf32, #tpu.memory_space<vmem>>, vector<16x64xf32>
      tpu.vector_store %arg7[%c0_11, %c0_12], %14 {strides = array<i32>} : memref<16x64xf32, #tpu.memory_space<vmem>>, vector<16x64xf32>,
    } else {
    }
    %c0 = arith.constant 0 : index
    %c0_1 = arith.constant 0 : index
    %3 = vector.load %arg7[%c0, %c0_1] : memref<16x64xf32, #tpu.memory_space<vmem>>, vector<16x64xf32>
    %c0_2 = arith.constant 0 : index
    %c0_3 = arith.constant 0 : index
    %4 = vector.load %arg3[%c0_2, %c0_3] : memref<16x32xf32, #tpu.memory_space<vmem>>, vector<16x32xf32>
    %5 = arith.truncf %4 : vector<16x32xf32> to vector<16x32xbf16>
    %c0_4 = arith.constant 0 : index
    %c0_5 = arith.constant 0 : index
    %6 = vector.load %arg4[%c0_4, %c0_5] : memref<32x64xf32, #tpu.memory_space<vmem>>, vector<32x64xf32>
    %7 = arith.truncf %6 : vector<32x64xf32> to vector<32x64xbf16>
    %cst = arith.constant dense<0.000000e+00> : vector<16x64xf32>
    %8 = tpu.matmul %5, %7, %cst {dimension_numbers = #tpu.dot_dimension_numbers<[1], [0], [0], [1], [0, 0, 1, 1], [], []>} : vector<16x32xbf16>, vector<32x64xbf16>, vector<16x64xf32> -> vector<16x64xf32>
    %9 = arith.addf %3, %8 : vector<16x64xf32>
    %c0_6 = arith.constant 0 : index
    %c0_7 = arith.constant 0 : index
    %10 = vector.load %arg7[%c0_6, %c0_7] : memref<16x64xf32, #tpu.memory_space<vmem>>, vector<16x64xf32>
    tpu.vector_store %arg7[%c0_6, %c0_7], %9 {strides = array<i32>} : memref<16x64xf32, #tpu.memory_space<vmem>>, vector<16x64xf32>,
    %c0_i32_8 = arith.constant 0 : i32
    %11 = arith.cmpi eq, %arg2, %c0_i32_8 : i32
    %12 = arith.extui %11 : i1 to i32
    %c0_i32_9 = arith.constant 0 : i32
    %13 = arith.cmpi ne, %12, %c0_i32_9 : i32
    scf.if %13 {
      %c0_10 = arith.constant 0 : index
      %c0_11 = arith.constant 0 : index
      %14 = vector.load %arg7[%c0_10, %c0_11] : memref<16x64xf32, #tpu.memory_space<vmem>>, vector<16x64xf32>
      %c0_12 = arith.constant 0 : index
      %c0_13 = arith.constant 0 : index
      %15 = vector.load %arg5[%c0_12, %c0_13] : memref<1x64xf32, #tpu.memory_space<vmem>>, vector<1x64xf32>
      %16 = vector.broadcast %15 : vector<1x64xf32> to vector<16x64xf32>
      %17 = arith.addf %14, %16 : vector<16x64xf32>
      %c0_14 = arith.constant 0 : index
      %c0_15 = arith.constant 0 : index
      %18 = vector.load %arg6[%c0_14, %c0_15] : memref<16x64xf32, #tpu.memory_space<vmem>>, vector<16x64xf32>
      tpu.vector_store %arg6[%c0_14, %c0_15], %17 {strides = array<i32>} : memref<16x64xf32, #tpu.memory_space<vmem>>, vector<16x64xf32>,
    } else {
    }
    return
  }
  func.func @transform_0(%arg0: i32, %arg1: i32, %arg2: i32) -> (i32, i32) {
    %c0_i32 = arith.constant 0 : i32
    return %arg0, %arg2 : i32, i32
  }
  func.func @transform_1(%arg0: i32, %arg1: i32, %arg2: i32) -> (i32, i32) {
    %c0_i32 = arith.constant 0 : i32
    return %arg2, %arg1 : i32, i32
  }
  func.func @transform_2(%arg0: i32, %arg1: i32, %arg2: i32) -> (i32, i32) {
    %c0_i32 = arith.constant 0 : i32
    %c0_i32_0 = arith.constant 0 : i32
    return %c0_i32, %arg1 : i32, i32
  }
  func.func @transform_3(%arg0: i32, %arg1: i32, %arg2: i32) -> (i32, i32) {
    %c0_i32 = arith.constant 0 : i32
    return %arg0, %arg1 : i32, i32
  }
}

module attributes {stable_mosaic.version = 11 : i64} {
  func.func @_attention_kernel(%arg0: i32, %arg1: memref<1x8x32xf32, #tpu.memory_space<vmem>>, %arg2: memref<1x8x32xf32, #tpu.memory_space<vmem>>, %arg3: memref<1x8x32xf32, #tpu.memory_space<vmem>>, %arg4: memref<1x8x8xf32, #tpu.memory_space<vmem>>, %arg5: memref<1x8x32xf32, #tpu.memory_space<vmem>>) attributes {dimension_semantics = [#tpu.dimension_semantics<parallel>], iteration_bounds = array<i64: 2>, scalar_prefetch = 0 : i64, scratch_operands = 0 : i64, tpu.core_type = #tpu.core_type<tc>, window_params = [{transform_indices = @transform_0, window_bounds = array<i64: 1, 8, 32>}, {transform_indices = @transform_1, window_bounds = array<i64: 1, 8, 32>}, {transform_indices = @transform_2, window_bounds = array<i64: 1, 8, 32>}, {transform_indices = @transform_3, window_bounds = array<i64: 1, 8, 8>}, {transform_indices = @transform_4, window_bounds = array<i64: 1, 8, 32>}]} {
    %c0 = arith.constant 0 : index
    %c0_0 = arith.constant 0 : index
    %c0_1 = arith.constant 0 : index
    %0 = vector.load %arg1[%c0, %c0_0, %c0_1] : memref<1x8x32xf32, #tpu.memory_space<vmem>>, vector<1x8x32xf32>
    %1 = vector.shape_cast %0 : vector<1x8x32xf32> to vector<8x32xf32>
    %c0_2 = arith.constant 0 : index
    %c0_3 = arith.constant 0 : index
    %c0_4 = arith.constant 0 : index
    %2 = vector.load %arg2[%c0_2, %c0_3, %c0_4] : memref<1x8x32xf32, #tpu.memory_space<vmem>>, vector<1x8x32xf32>
    %3 = vector.shape_cast %2 : vector<1x8x32xf32> to vector<8x32xf32>
    %c0_5 = arith.constant 0 : index
    %c0_6 = arith.constant 0 : index
    %c0_7 = arith.constant 0 : index
    %4 = vector.load %arg3[%c0_5, %c0_6, %c0_7] : memref<1x8x32xf32, #tpu.memory_space<vmem>>, vector<1x8x32xf32>
    %5 = vector.shape_cast %4 : vector<1x8x32xf32> to vector<8x32xf32>
    %c0_8 = arith.constant 0 : index
    %c0_9 = arith.constant 0 : index
    %c0_10 = arith.constant 0 : index
    %6 = vector.load %arg4[%c0_8, %c0_9, %c0_10] : memref<1x8x8xf32, #tpu.memory_space<vmem>>, vector<1x8x8xf32>
    %7 = vector.shape_cast %6 : vector<1x8x8xf32> to vector<8x8xf32>
    %cst = arith.constant 5.000000e-01 : f32
    %8 = vector.broadcast %cst : f32 to vector<8x8xf32>
    %9 = arith.cmpf ogt, %7, %8 : vector<8x8xf32>
    %10 = vector.extract_strided_slice %1 {offsets = [0, 0], sizes = [8, 16], strides = [1, 1]} : vector<8x32xf32> to vector<8x16xf32>
    %11 = arith.truncf %10 : vector<8x16xf32> to vector<8x16xbf16>
    %12 = vector.extract_strided_slice %3 {offsets = [0, 0], sizes = [8, 16], strides = [1, 1]} : vector<8x32xf32> to vector<8x16xf32>
    %13 = arith.truncf %12 : vector<8x16xf32> to vector<8x16xbf16>
    %14 = vector.extract_strided_slice %5 {offsets = [0, 0], sizes = [8, 16], strides = [1, 1]} : vector<8x32xf32> to vector<8x16xf32>
    %15 = arith.truncf %14 : vector<8x16xf32> to vector<8x16xbf16>
    %cst_11 = arith.constant dense<0.000000e+00> : vector<8x8xf32>
    %16 = tpu.matmul %11, %13, %cst_11 {dimension_numbers = #tpu.dot_dimension_numbers<[1], [1], [0], [0], [0, 0, 1, 0], [], []>} : vector<8x16xbf16>, vector<8x16xbf16>, vector<8x8xf32> -> vector<8x8xf32>
    %cst_12 = arith.constant 2.500000e-01 : f32
    %17 = vector.broadcast %cst_12 : f32 to vector<8x8xf32>
    %18 = arith.mulf %16, %17 : vector<8x8xf32>
    %cst_13 = arith.constant -1.000000e+09 : f32
    %19 = vector.broadcast %cst_13 : f32 to vector<8x8xf32>
    %20 = arith.select %9, %18, %19 : vector<8x8xi1>, vector<8x8xf32>
    %cst_14 = arith.constant dense<0xFF800000> : vector<8xf32>
    %21 = vector.multi_reduction <maximumf>, %20, %cst_14 [1] : vector<8x8xf32> to vector<8xf32>
    %22 = vector.shape_cast %21 : vector<8xf32> to vector<8x1xf32>
    %23 = vector.broadcast %22 : vector<8x1xf32> to vector<8x8xf32>
    %24 = arith.subf %20, %23 : vector<8x8xf32>
    %25 = math.exp %24 : vector<8x8xf32>
    %cst_15 = arith.constant dense<0.000000e+00> : vector<8xf32>
    %26 = vector.multi_reduction <add>, %25, %cst_15 [1] : vector<8x8xf32> to vector<8xf32>
    %27 = vector.shape_cast %26 : vector<8xf32> to vector<8x1xf32>
    %28 = tpu.reciprocal %27 {approx = true} : vector<8x1xf32> -> vector<8x1xf32>
    %29 = vector.broadcast %28 : vector<8x1xf32> to vector<8x8xf32>
    %30 = arith.mulf %25, %29 : vector<8x8xf32>
    %31 = arith.truncf %30 : vector<8x8xf32> to vector<8x8xbf16>
    %cst_16 = arith.constant dense<0.000000e+00> : vector<8x16xf32>
    %32 = tpu.matmul %31, %15, %cst_16 {dimension_numbers = #tpu.dot_dimension_numbers<[1], [0], [0], [1], [0, 0, 1, 1], [], []>} : vector<8x8xbf16>, vector<8x16xbf16>, vector<8x16xf32> -> vector<8x16xf32>
    %33 = vector.extract_strided_slice %1 {offsets = [0, 16], sizes = [8, 16], strides = [1, 1]} : vector<8x32xf32> to vector<8x16xf32>
    %34 = arith.truncf %33 : vector<8x16xf32> to vector<8x16xbf16>
    %35 = vector.extract_strided_slice %3 {offsets = [0, 16], sizes = [8, 16], strides = [1, 1]} : vector<8x32xf32> to vector<8x16xf32>
    %36 = arith.truncf %35 : vector<8x16xf32> to vector<8x16xbf16>
    %37 = vector.extract_strided_slice %5 {offsets = [0, 16], sizes = [8, 16], strides = [1, 1]} : vector<8x32xf32> to vector<8x16xf32>
    %38 = arith.truncf %37 : vector<8x16xf32> to vector<8x16xbf16>
    %cst_17 = arith.constant dense<0.000000e+00> : vector<8x8xf32>
    %39 = tpu.matmul %34, %36, %cst_17 {dimension_numbers = #tpu.dot_dimension_numbers<[1], [1], [0], [0], [0, 0, 1, 0], [], []>} : vector<8x16xbf16>, vector<8x16xbf16>, vector<8x8xf32> -> vector<8x8xf32>
    %cst_18 = arith.constant 2.500000e-01 : f32
    %40 = vector.broadcast %cst_18 : f32 to vector<8x8xf32>
    %41 = arith.mulf %39, %40 : vector<8x8xf32>
    %cst_19 = arith.constant -1.000000e+09 : f32
    %42 = vector.broadcast %cst_19 : f32 to vector<8x8xf32>
    %43 = arith.select %9, %41, %42 : vector<8x8xi1>, vector<8x8xf32>
    %cst_20 = arith.constant dense<0xFF800000> : vector<8xf32>
    %44 = vector.multi_reduction <maximumf>, %43, %cst_20 [1] : vector<8x8xf32> to vector<8xf32>
    %45 = vector.shape_cast %44 : vector<8xf32> to vector<8x1xf32>
    %46 = vector.broadcast %45 : vector<8x1xf32> to vector<8x8xf32>
    %47 = arith.subf %43, %46 : vector<8x8xf32>
    %48 = math.exp %47 : vector<8x8xf32>
    %cst_21 = arith.constant dense<0.000000e+00> : vector<8xf32>
    %49 = vector.multi_reduction <add>, %48, %cst_21 [1] : vector<8x8xf32> to vector<8xf32>
    %50 = vector.shape_cast %49 : vector<8xf32> to vector<8x1xf32>
    %51 = tpu.reciprocal %50 {approx = true} : vector<8x1xf32> -> vector<8x1xf32>
    %52 = vector.broadcast %51 : vector<8x1xf32> to vector<8x8xf32>
    %53 = arith.mulf %48, %52 : vector<8x8xf32>
    %54 = arith.truncf %53 : vector<8x8xf32> to vector<8x8xbf16>
    %cst_22 = arith.constant dense<0.000000e+00> : vector<8x16xf32>
    %55 = tpu.matmul %54, %38, %cst_22 {dimension_numbers = #tpu.dot_dimension_numbers<[1], [0], [0], [1], [0, 0, 1, 1], [], []>} : vector<8x8xbf16>, vector<8x16xbf16>, vector<8x16xf32> -> vector<8x16xf32>
    %56 = tpu.concatenate %32, %55 in 1 : vector<8x16xf32>, vector<8x16xf32> -> vector<8x32xf32>
    %c0_23 = arith.constant 0 : index
    %c0_24 = arith.constant 0 : index
    %c0_25 = arith.constant 0 : index
    %57 = vector.load %arg5[%c0_23, %c0_24, %c0_25] : memref<1x8x32xf32, #tpu.memory_space<vmem>>, vector<1x8x32xf32>
    %58 = vector.shape_cast %57 : vector<1x8x32xf32> to vector<8x32xf32>
    %59 = vector.shape_cast %56 : vector<8x32xf32> to vector<1x8x32xf32>
    tpu.vector_store %arg5[%c0_23, %c0_24, %c0_25], %59 {strides = array<i32>} : memref<1x8x32xf32, #tpu.memory_space<vmem>>, vector<1x8x32xf32>,
    return
  }
  func.func @transform_0(%arg0: i32) -> (i32, i32, i32) {
    %c0_i32 = arith.constant 0 : i32
    %c0_i32_0 = arith.constant 0 : i32
    %c0_i32_1 = arith.constant 0 : i32
    return %arg0, %c0_i32, %c0_i32_0 : i32, i32, i32
  }
  func.func @transform_1(%arg0: i32) -> (i32, i32, i32) {
    %c0_i32 = arith.constant 0 : i32
    %c0_i32_0 = arith.constant 0 : i32
    %c0_i32_1 = arith.constant 0 : i32
    return %arg0, %c0_i32, %c0_i32_0 : i32, i32, i32
  }
  func.func @transform_2(%arg0: i32) -> (i32, i32, i32) {
    %c0_i32 = arith.constant 0 : i32
    %c0_i32_0 = arith.constant 0 : i32
    %c0_i32_1 = arith.constant 0 : i32
    return %arg0, %c0_i32, %c0_i32_0 : i32, i32, i32
  }
  func.func @transform_3(%arg0: i32) -> (i32, i32, i32) {
    %c0_i32 = arith.constant 0 : i32
    %c0_i32_0 = arith.constant 0 : i32
    %c0_i32_1 = arith.constant 0 : i32
    return %arg0, %c0_i32, %c0_i32_0 : i32, i32, i32
  }
  func.func @transform_4(%arg0: i32) -> (i32, i32, i32) {
    %c0_i32 = arith.constant 0 : i32
    %c0_i32_0 = arith.constant 0 : i32
    %c0_i32_1 = arith.constant 0 : i32
    return %arg0, %c0_i32, %c0_i32_0 : i32, i32, i32
  }
}

module attributes {stable_mosaic.version = 11 : i64} {
  func.func @_linear_kernel(%arg0: i32, %arg1: i32, %arg2: i32, %arg3: memref<16x32xf32, #tpu.memory_space<vmem>>, %arg4: memref<32x50xf32, #tpu.memory_space<vmem>>, %arg5: memref<1x50xf32, #tpu.memory_space<vmem>>, %arg6: memref<16x50xf32, #tpu.memory_space<vmem>>, %arg7: memref<16x50xf32, #tpu.memory_space<vmem>>) attributes {dimension_semantics = [#tpu.dimension_semantics<parallel>, #tpu.dimension_semantics<parallel>, #tpu.dimension_semantics<arbitrary>], iteration_bounds = array<i64: 1, 1, 1>, scalar_prefetch = 0 : i64, scratch_operands = 1 : i64, tpu.core_type = #tpu.core_type<tc>, window_params = [{transform_indices = @transform_0, window_bounds = array<i64: 16, 32>}, {transform_indices = @transform_1, window_bounds = array<i64: 32, 50>}, {transform_indices = @transform_2, window_bounds = array<i64: 1, 50>}, {transform_indices = @transform_3, window_bounds = array<i64: 16, 50>}]} {
    %c0_i32 = arith.constant 0 : i32
    %0 = arith.cmpi eq, %arg2, %c0_i32 : i32
    %1 = arith.extui %0 : i1 to i32
    %c0_i32_0 = arith.constant 0 : i32
    %2 = arith.cmpi ne, %1, %c0_i32_0 : i32
    scf.if %2 {
      %cst_10 = arith.constant 0.000000e+00 : f32
      %14 = vector.broadcast %cst_10 : f32 to vector<16x50xf32>
      %c0_11 = arith.constant 0 : index
      %c0_12 = arith.constant 0 : index
      %15 = vector.load %arg7[%c0_11, %c0_12] : memref<16x50xf32, #tpu.memory_space<vmem>>, vector<16x50xf32>
      tpu.vector_store %arg7[%c0_11, %c0_12], %14 {strides = array<i32>} : memref<16x50xf32, #tpu.memory_space<vmem>>, vector<16x50xf32>,
    } else {
    }
    %c0 = arith.constant 0 : index
    %c0_1 = arith.constant 0 : index
    %3 = vector.load %arg7[%c0, %c0_1] : memref<16x50xf32, #tpu.memory_space<vmem>>, vector<16x50xf32>
    %c0_2 = arith.constant 0 : index
    %c0_3 = arith.constant 0 : index
    %4 = vector.load %arg3[%c0_2, %c0_3] : memref<16x32xf32, #tpu.memory_space<vmem>>, vector<16x32xf32>
    %5 = arith.truncf %4 : vector<16x32xf32> to vector<16x32xbf16>
    %c0_4 = arith.constant 0 : index
    %c0_5 = arith.constant 0 : index
    %6 = vector.load %arg4[%c0_4, %c0_5] : memref<32x50xf32, #tpu.memory_space<vmem>>, vector<32x50xf32>
    %7 = arith.truncf %6 : vector<32x50xf32> to vector<32x50xbf16>
    %cst = arith.constant dense<0.000000e+00> : vector<16x50xf32>
    %8 = tpu.matmul %5, %7, %cst {dimension_numbers = #tpu.dot_dimension_numbers<[1], [0], [0], [1], [0, 0, 1, 1], [], []>} : vector<16x32xbf16>, vector<32x50xbf16>, vector<16x50xf32> -> vector<16x50xf32>
    %9 = arith.addf %3, %8 : vector<16x50xf32>
    %c0_6 = arith.constant 0 : index
    %c0_7 = arith.constant 0 : index
    %10 = vector.load %arg7[%c0_6, %c0_7] : memref<16x50xf32, #tpu.memory_space<vmem>>, vector<16x50xf32>
    tpu.vector_store %arg7[%c0_6, %c0_7], %9 {strides = array<i32>} : memref<16x50xf32, #tpu.memory_space<vmem>>, vector<16x50xf32>,
    %c0_i32_8 = arith.constant 0 : i32
    %11 = arith.cmpi eq, %arg2, %c0_i32_8 : i32
    %12 = arith.extui %11 : i1 to i32
    %c0_i32_9 = arith.constant 0 : i32
    %13 = arith.cmpi ne, %12, %c0_i32_9 : i32
    scf.if %13 {
      %c0_10 = arith.constant 0 : index
      %c0_11 = arith.constant 0 : index
      %14 = vector.load %arg7[%c0_10, %c0_11] : memref<16x50xf32, #tpu.memory_space<vmem>>, vector<16x50xf32>
      %c0_12 = arith.constant 0 : index
      %c0_13 = arith.constant 0 : index
      %15 = vector.load %arg5[%c0_12, %c0_13] : memref<1x50xf32, #tpu.memory_space<vmem>>, vector<1x50xf32>
      %16 = vector.broadcast %15 : vector<1x50xf32> to vector<16x50xf32>
      %17 = arith.addf %14, %16 : vector<16x50xf32>
      %c0_14 = arith.constant 0 : index
      %c0_15 = arith.constant 0 : index
      %18 = vector.load %arg6[%c0_14, %c0_15] : memref<16x50xf32, #tpu.memory_space<vmem>>, vector<16x50xf32>
      tpu.vector_store %arg6[%c0_14, %c0_15], %17 {strides = array<i32>} : memref<16x50xf32, #tpu.memory_space<vmem>>, vector<16x50xf32>,
    } else {
    }
    return
  }
  func.func @transform_0(%arg0: i32, %arg1: i32, %arg2: i32) -> (i32, i32) {
    %c0_i32 = arith.constant 0 : i32
    return %arg0, %arg2 : i32, i32
  }
  func.func @transform_1(%arg0: i32, %arg1: i32, %arg2: i32) -> (i32, i32) {
    %c0_i32 = arith.constant 0 : i32
    return %arg2, %arg1 : i32, i32
  }
  func.func @transform_2(%arg0: i32, %arg1: i32, %arg2: i32) -> (i32, i32) {
    %c0_i32 = arith.constant 0 : i32
    %c0_i32_0 = arith.constant 0 : i32
    return %c0_i32, %arg1 : i32, i32
  }
  func.func @transform_3(%arg0: i32, %arg1: i32, %arg2: i32) -> (i32, i32) {
    %c0_i32 = arith.constant 0 : i32
    return %arg0, %arg1 : i32, i32
  }
}

</mosaic_0001>

<bundles_post_ra>
// kernel: transformer_forward.37
= control target key start
LH: loop header
LB: loop body
LE: loop exit
PB: predicated region body
PF: predicated region fallthrough
CT: control target
= control target key end

     0   :  { %vm19_vm0 = vcmask 261120   ;;  %v117_v0 = vmov 0.0   ;;  %vm118_vm1 = vmmov 0   ;;  %s173_s1 = inlined_call_operand.vmem [shape: f32[32,32], index: 1, kind: input, shape index: {}]   ;;  %s174_s0 = inlined_call_operand.vmem [shape: f32[16,32], index: 0, kind: input, shape index: {}]   ;;  %s175_s2 = inlined_call_operand.vmem [shape: f32[1,32], index: 2, kind: input, shape index: {}]   ;;  %s176_s3 = inlined_call_operand.vmem [shape: f32[16,32], index: 3, kind: output, shape index: {}]  }
   0x1   :  { %107 = vmatprep.subr.bf16.mxu0 %v117_v0  ;;  %v27_v1 = vld [vmem:[%s173_s1] sm:$0xff]  ;;  %v28_v2 = vld [vmem:[%s173_s1 + $0x8] sm:$0xff]  ;;  %v29_v3 = vld [vmem:[%s173_s1 + $0x10] sm:$0xff]  ;;  %111 = vmatprep.mubr.msk.bf16.mxu0 %vm118_vm1, %v117_v0  ;;  %20 = vst.msk [vmem:[#allocation2] sm:$0xff] %vm19_vm0, %v117_v0 }
   0x2   :  { %21 = vst.msk [vmem:[#allocation2 + $0x8] sm:$0xff] %vm19_vm0, %v117_v0  ;;  %v31_v4 = vpack.c.bf16 %v28_v2, %v27_v1  ;;  %v30_v5 = vld [vmem:[%s173_s1 + $0x18] sm:$0xff]  ;;  %v24_v7 = vld [vmem:[%s174_s0] sm:$0xff]  ;;  %v25_v8 = vld [vmem:[%s174_s0 + $0x8] sm:$0xff] }
   0x3   :  { %v32_v6 = vpack.c.bf16 %v30_v5, %v29_v3  ;;  %v26_v9 = vpack.c.bf16 %v25_v8, %v24_v7  ;;  %v103_v18 = vld [vmem:[%s175_s2] ss:$0 sm:$0xff] }
   0x4   :  { %108 = vmatpush3.bf16.msra.mxu0 %v31_v4 }
   0x5   :  { %109 = vmatprep.subr.bf16.mxu0 %v117_v0 }
   0x8   :  { %110 = vmatpush3.bf16.msra.mxu0 %v32_v6  ;;  %v22_v10 = vld [vmem:[#allocation2] sm:$0xff] }
   0x9   :  { %v23_v12 = vld [vmem:[#allocation2 + $0x8] sm:$0xff] }
   0xb   :  { %112 = vmatmul.mubr.msk.bf16.vlgmr.msra.gmra.mrb[0].mxu0 %vm19_vm0, %v26_v9 }
  0xde   :  { %v71_v11 = vpop.f32.mrb[0].mxu0 }
  0xdf   :  { %v78_v13 = vadd.f32 %v71_v11, %v22_v10  ;;  %v113_v14 = vpop.f32.mrb[1].mxu0 }
  0xe0   :  { %v74_v15 = vpop.f32.mrb[2].mxu0 }
  0xe1   :  { %80 = vst.msk [vmem:[#allocation2] sm:$0xff] %vm19_vm0, %v78_v13  ;;  %v79_v16 = vadd.f32 %v74_v15, %v23_v12  ;;  %v114_v17 = vpop.f32.mrb[3].mxu0 }
  0xe3   :  { %81 = vst.msk [vmem:[#allocation2 + $0x8] sm:$0xff] %vm19_vm0, %v79_v16 }
  0xe8   :  { %v85_v19 = vld [vmem:[#allocation2] sm:$0xff] }
  0xe9   :  { %v94_v20 = vadd.f32 %v103_v18, %v85_v19 }
  0xea   :  { %v86_v21 = vld [vmem:[#allocation2 + $0x8] sm:$0xff] }
  0xeb   :  { %96 = vst.msk [vmem:[%s176_s3] sm:$0xff] %vm19_vm0, %v94_v20  ;;  %v95_v22 = vadd.f32 %v103_v18, %v86_v21 }
  0xed   :  { %97 = vst.msk [vmem:[%s176_s3 + $0x8] sm:$0xff] %vm19_vm0, %v95_v22 }

// kernel: transformer_forward.35
= control target key start
LH: loop header
LB: loop body
LE: loop exit
PB: predicated region body
PF: predicated region fallthrough
CT: control target
= control target key end

     0   :  { %vm19_vm0 = vcmask 785408   ;;  %v118_v0 = vmov 0.0   ;;  %vm119_vm1 = vmmov 0   ;;  %vm33_vm2 = vcmask 261120   ;;  %s173_s1 = inlined_call_operand.vmem [shape: f32[32,96], index: 1, kind: input, shape index: {}]   ;;  %s174_s0 = inlined_call_operand.vmem [shape: f32[16,32], index: 0, kind: input, shape index: {}]   ;;  %s175_s2 = inlined_call_operand.vmem [shape: f32[1,96], index: 2, kind: input, shape index: {}]   ;;  %s176_s3 = inlined_call_operand.vmem [shape: f32[16,96], index: 3, kind: output, shape index: {}]  }
   0x1   :  { %108 = vmatprep.subr.bf16.mxu0 %v118_v0  ;;  %v27_v1 = vld [vmem:[%s173_s1] sm:$0xff]  ;;  %v28_v2 = vld [vmem:[%s173_s1 + $0x8] sm:$0xff]  ;;  %v29_v3 = vld [vmem:[%s173_s1 + $0x10] sm:$0xff]  ;;  %112 = vmatprep.mubr.msk.bf16.mxu0 %vm119_vm1, %v118_v0  ;;  %20 = vst.msk [vmem:[#allocation2] sm:$0xff] %vm19_vm0, %v118_v0 }
   0x2   :  { %21 = vst.msk [vmem:[#allocation2 + $0x8] sm:$0xff] %vm19_vm0, %v118_v0  ;;  %v31_v4 = vpack.c.bf16 %v28_v2, %v27_v1  ;;  %v30_v5 = vld [vmem:[%s173_s1 + $0x18] sm:$0xff]  ;;  %v24_v7 = vld [vmem:[%s174_s0] sm:$0xff]  ;;  %v25_v8 = vld [vmem:[%s174_s0 + $0x8] sm:$0xff] }
   0x3   :  { %v32_v6 = vpack.c.bf16 %v30_v5, %v29_v3  ;;  %v26_v9 = vpack.c.bf16 %v25_v8, %v24_v7  ;;  %v104_v18 = vld [vmem:[%s175_s2] ss:$0 sm:$0xff] }
   0x4   :  { %109 = vmatpush3.bf16.msra.mxu0 %v31_v4 }
   0x5   :  { %110 = vmatprep.subr.bf16.mxu0 %v118_v0 }
   0x8   :  { %111 = vmatpush3.bf16.msra.mxu0 %v32_v6  ;;  %v22_v10 = vld [vmem:[#allocation2] sm:$0xff] }
   0x9   :  { %v23_v12 = vld [vmem:[#allocation2 + $0x8] sm:$0xff] }
   0xb   :  { %113 = vmatmul.mubr.msk.bf16.vlgmr.msra.gmra.mrb[0].mxu0 %vm33_vm2, %v26_v9 }
  0xde   :  { %v71_v11 = vpop.f32.mrb[0].mxu0 }
  0xdf   :  { %v78_v13 = vadd.f32 %v71_v11, %v22_v10  ;;  %v114_v14 = vpop.f32.mrb[1].mxu0 }
  0xe0   :  { %v74_v15 = vpop.f32.mrb[2].mxu0 }
  0xe1   :  { %81 = vst.msk [vmem:[#allocation2] sm:$0xff] %vm19_vm0, %v78_v13  ;;  %v79_v16 = vadd.f32 %v74_v15, %v23_v12  ;;  %v115_v17 = vpop.f32.mrb[3].mxu0 }
  0xe3   :  { %82 = vst.msk [vmem:[#allocation2 + $0x8] sm:$0xff] %vm19_vm0, %v79_v16 }
  0xe8   :  { %v86_v19 = vld [vmem:[#allocation2] sm:$0xff] }
  0xe9   :  { %v95_v20 = vadd.f32 %v104_v18, %v86_v19 }
  0xea   :  { %v87_v21 = vld [vmem:[#allocation2 + $0x8] sm:$0xff] }
  0xeb   :  { %97 = vst.msk [vmem:[%s176_s3] sm:$0xff] %vm19_vm0, %v95_v20  ;;  %v96_v22 = vadd.f32 %v104_v18, %v87_v21 }
  0xed   :  { %98 = vst.msk [vmem:[%s176_s3 + $0x8] sm:$0xff] %vm19_vm0, %v96_v22 }

// kernel: transformer_forward.38
= control target key start
LH: loop header
LB: loop body
LE: loop exit
PB: predicated region body
PF: predicated region fallthrough
CT: control target
= control target key end

     0   :  { %vm23_vm0 = vcmask 261120   ;;  %s136_s0 = inlined_call_operand.vmem [shape: f32[16,32], index: 0, kind: input, shape index: {}]   ;;  %s137_s1 = inlined_call_operand.vmem [shape: f32[16,32], index: 1, kind: input, shape index: {}]   ;;  %s138_s2 = inlined_call_operand.vmem [shape: f32[1,32], index: 2, kind: input, shape index: {}]   ;;  %s139_s3 = inlined_call_operand.vmem [shape: f32[1,32], index: 3, kind: input, shape index: {}]   ;;  %s140_s4 = inlined_call_operand.vmem [shape: f32[16,32], index: 4, kind: output, shape index: {}]  }
   0x1   :  { %v17_v0 = vld [vmem:[%s136_s0] sm:$0xff]  ;;  %v18_v2 = vld [vmem:[%s136_s0 + $0x8] sm:$0xff] }
   0x2   :  { %v19_v1 = vld [vmem:[%s137_s1] sm:$0xff]  ;;  %v20_v4 = vld [vmem:[%s137_s1 + $0x8] sm:$0xff] }
   0x3   :  { %v21_v3 = vadd.f32 %v19_v1, %v17_v0  ;;  %v22_v5 = vadd.f32 %v20_v4, %v18_v2  ;;  %v75_v25 = vld [vmem:[%s138_s2] ss:$0 sm:$0xff] }
   0x4   :  { %v76_v27 = vld [vmem:[%s139_s3] ss:$0 sm:$0xff] }
   0x5   :  { %v24_v6 = vsel %vm23_vm0, %v21_v3, 0.0  ;;  %v27_v7 = vsel %vm23_vm0, %v22_v5, 0.0 }
   0x6   :  { %25 = vadd.xlane.f32.xlu0 %v24_v6 }
   0xa   :  { %28 = vadd.xlane.f32.xlu0 %v27_v7 }
  0x93   :  { %v26_v8 = vpop.xlane.xlu0 %25 }
  0x94   :  { %v31_v9 = vmul.f32 0.03125, %v26_v8 }
  0x96   :  { %v33_v10 = vsub.f32 %v21_v3, %v31_v9 }
  0x97   :  { %v29_v11 = vpop.xlane.xlu0 %28 }
  0x98   :  { %v32_v12 = vmul.f32 0.03125, %v29_v11  ;;  %v35_v13 = vmul.f32 %v33_v10, %v33_v10 }
  0x9a   :  { %v34_v14 = vsub.f32 %v22_v5, %v32_v12  ;;  %v37_v15 = vsel %vm23_vm0, %v35_v13, 0.0 }
  0x9b   :  { %38 = vadd.xlane.f32.xlu1 %v37_v15 }
  0x9c   :  { %v36_v16 = vmul.f32 %v34_v14, %v34_v14 }
  0x9e   :  { %v40_v17 = vsel %vm23_vm0, %v36_v16, 0.0 }
  0x9f   :  { %41 = vadd.xlane.f32.xlu1 %v40_v17 }
 0x128   :  { %v39_v18 = vpop.xlane.xlu1 %38 }
 0x129   :  { %v43_v19 = vmul.f32 0.03125, %v39_v18 }
 0x12b   :  { %v45_v20 = vadd.f32 1e-05, %v43_v19 }
 0x12c   :  { %v42_v21 = vpop.xlane.xlu1 %41 }
 0x12d   :  { %77 = vrsqrt.f32 %v45_v20  ;;  %v44_v22 = vmul.f32 0.03125, %v42_v21 }
 0x12f   :  { %v46_v23 = vadd.f32 1e-05, %v44_v22 }
 0x131   :  { %79 = vrsqrt.f32 %v46_v23 }
 0x137   :  { %v78_v24 = vpop.eup %77 }
 0x138   :  { %v49_v26 = vmul.f32 %v78_v24, %v33_v10 }
 0x13a   :  { %v58_v28 = vmul.f32 %v75_v25, %v49_v26 }
 0x13b   :  { %v80_v29 = vpop.eup %79 }
 0x13c   :  { %v67_v30 = vadd.f32 %v76_v27, %v58_v28  ;;  %v50_v31 = vmul.f32 %v80_v29, %v34_v14 }
 0x13e   :  { %69 = vst.msk [vmem:[%s140_s4] sm:$0xff] %vm23_vm0, %v67_v30  ;;  %v59_v32 = vmul.f32 %v75_v25, %v50_v31 }
 0x140   :  { %v68_v33 = vadd.f32 %v76_v27, %v59_v32 }
 0x142   :  { %70 = vst.msk [vmem:[%s140_s4 + $0x8] sm:$0xff] %vm23_vm0, %v68_v33 }

// kernel: transformer_forward.36
= control target key start
LH: loop header
LB: loop body
LE: loop exit
PB: predicated region body
PF: predicated region fallthrough
CT: control target
= control target key end

     0   :  { %s679_s15 = smov 0   ;;  %s741_s0 = inlined_call_operand.vmem [shape: f32[2,8,32], index: 0, kind: input, shape index: {}]   ;;  %s742_s1 = inlined_call_operand.vmem [shape: f32[2,8,32], index: 1, kind: input, shape index: {}]   ;;  %s743_s2 = inlined_call_operand.vmem [shape: f32[2,8,32], index: 2, kind: input, shape index: {}]   ;;  %s744_s3 = inlined_call_operand.vmem [shape: f32[2,1,8], index: 3, kind: input, shape index: {}]   ;;  %s745_s4 = inlined_call_operand.vmem [shape: f32[2,8,32], index: 4, kind: output, shape index: {}]  }
   0x1 LB: > { %s573_s16 = sadd.s32 4294967295, %s647_s15   ;;  %p577_p0 = scmp.ge.s32.totalorder %s647_s15, 1  ;;  %s647_s15 = sphi %s679_s15, %s14_s15  }
   0x2   : > { %p187_p1 = scmp.lt.s32.totalorder %s647_s15, 3 }
   0x4   : > { %p188_p2 = pnand %p577_p0, %p187_p1 }
   0x5   : > { %p222_p3 = scmp.lt.s32.totalorder (!%p188_p2), %s573_s16, 1  ;;  %v649_v0 = vmov (!%p188_p2), 0.0   ;;  %vm650_vm0 = vmmov (!%p188_p2), 0   ;;  %vm250_vm1 = vcmask (!%p188_p2), 130048   ;;  %v299_v6 = vlaneseq (!%p188_p2)  ;;  %s652_s27 = smov (!%p188_p2), 112  }
   0x6   : > { %191 = sbr.rel (%p188_p2) target bundleno = 1426 (0x592), region = 36  ;;  %596 = vmatprep.subr.bf16.mxu0 (!%p188_p2), %v649_v0  ;;  %598 = vmatprep.mubr.msk.bf16.mxu0 (!%p188_p2), %vm650_vm0, %v649_v0  ;;  %v651_v10 = vmov (!%p188_p2), 0   ;;  %vm305_vm4 = vcmask (!%p188_p2), 64512   ;;  %vm321_vm5 = vcmask (!%p188_p2), 1043456   ;;  %s653_s5 = smov (!%p188_p2), 16   ;;  %vm485_vm6 = vcmask (!%p188_p2), 261120  }
   0x7   : > { %602 = vmatprep.subr.bf16.mxu1 (!%p188_p2), %v649_v0  ;;  %604 = vmatprep.mubr.msk.bf16.mxu1 (!%p188_p2), %vm650_vm0, %v649_v0  ;;  %v300_v8 = vshrl.u32 (!%p188_p2), %v299_v6, 7 }
   0x9   : > { %v301_v9 = vsub.s32 (!%p188_p2), 0, %v300_v8 }
   0xd   : > { %s747_s16 = smov (!%p222_p3, %s573_s16), 1 }
   0xe   : > { %s693_s17 = sshll.u32 %s747_s16, 3  ;;  %s236_s26 = scalar_lea.vmem %s744_s3, %s747_s16 }
   0xf   : > { %s229_s20 = scalar_lea.vmem %s742_s1, %s693_s17  ;;  %s225_s23 = scalar_lea.vmem %s741_s0, %s693_s17  ;;  %v245_v7 = vld [vmem:[%s236_s26] sm:$0x1] }
  0x10   : > { %v243_v1 = vld [vmem:[%s229_s20] sm:$0xff]  ;;  %vm246_vm2 = vcmp.gt.f32.partialorder %v245_v7, 0.5  ;;  %s233_s30 = scalar_lea.vmem %s743_s2, %s693_s17  ;;  %s240_s8 = scalar_lea.vmem %s745_s4, %s693_s17 }
  0x11   : > { %v248_v2 = vpack.c.bf16 %v243_v1, %v243_v1  ;;  %v242_v4 = vld [vmem:[%s225_s23] sm:$0xff]  ;;  %v298_v11 = vsel %vm246_vm2, 1, %v651_v10 }
  0x12   : > { %v247_v5 = vpack.c.bf16 %v242_v4, %v242_v4  ;;  %v302_v12 = vrot.slane %v298_v11, %v301_v9  ;;  %v244_v25 = vld [vmem:[%s233_s30] sm:$0xff] }
  0x13   : > { %v255_v3 = vsel %vm250_vm1, %v248_v2, 0  ;;  %369 = vrot.lane.b32.xlu1 %v248_v2, %s652_s27  ;;  %v249_v26 = vpack.c.bf16 %v244_v25, %v244_v25 }
  0x14   : > { %597 = vmatpush3.bf16.xpose.msra.mxu0 %v255_v3  ;;  %vm303_vm3 = vcmp.eq.s32.totalorder %v302_v12, 1 }
  0x15   : > { %614 = vmatprep.subr.bf16.mxu0 %v649_v0  ;;  %v323_v27 = vsel %vm321_vm5, %v249_v26, 0 }
  0x16   : > { %603 = vmatpush3.bf16.msra.mxu1 %v323_v27 }
  0x17   : > { %366 = vrot.lane.b32.xlu1 %v247_v5, %s652_s27  ;;  %608 = vmatprep.subr.bf16.mxu1 %v649_v0 }
  0x1b   : > { %599 = vmatmul.mubr.msk.bf16.vlgmr.msra.gmra.mrb[0].mxu0 %vm250_vm1, %v247_v5 }
  0x1c   : > { %616 = vmatprep.mubr.msk.bf16.mxu0 %vm650_vm0, %v649_v0 }
  0x85   : > { %v370_v30 = vpop.permute.xlu1 %369 }
  0x86   : > { %v375_v32 = vsel %vm250_vm1, %v370_v30, 0 }
  0x89   : > { %v367_v34 = vpop.permute.xlu1 %366 }
  0xee   : > { %v291_v13 = vpop.f32.mrb[0].mxu0 }
  0xef   : > { %v297_v14 = vmul.f32 0.25, %v291_v13  ;;  %v600_v15 = vpop.f32.mrb[1].mxu0 }
  0xf0   : > { %v294_v16 = vpop.f32.mrb[2].mxu0 }
  0xf1   : > { %v601_v17 = vpop.f32.mrb[3].mxu0  ;;  %v304_v18 = vsel %vm303_vm3, %v297_v14, -1e+09 }
  0xf2   : > { %v306_v19 = vsel %vm305_vm4, %v304_v18, -inf }
  0xf3   : > { %307 = vmax.xlane.f32.xlu0 %v306_v19 }
 0x180   : > { %v308_v20 = vpop.xlane.xlu0 %307 }
 0x181   : > { %v309_v21 = vsub.f32 %v304_v18, %v308_v20 }
 0x183   : > { %v310_v22 = vmul.f32 1.442695, %v309_v21 }
 0x185   : > { %633 = vpow2.f32 %v310_v22 }
 0x18f   : > { %v634_v23 = vpop.eup %633 }
 0x190   : > { %v312_v24 = vsel %vm305_vm4, %v634_v23, 0.0 }
 0x191   : > { %313 = vadd.xlane.f32.xlu0 %v312_v24 }
 0x21e   : > { %v314_v28 = vpop.xlane.xlu0 %313 }
 0x21f   : > { %635 = vrcp.f32 %v314_v28 }
 0x229   : > { %v636_v29 = vpop.eup %635 }
 0x22a   : > { %v316_v31 = vmul.f32 %v636_v29, %v634_v23 }
 0x22c   : > { %v317_v33 = vpack.c.bf16 %v316_v31, %v316_v31 }
 0x22e   : > { %605 = vmatmul.mubr.msk.bf16.vlgmr.msra.gmra.mrb[0].mxu1 %vm305_vm4, %v317_v33 }
 0x22f   : > { %609 = vmatpush3.bf16.xpose.msra.mxu1 %v375_v32  ;;  %610 = vmatprep.mubr.msk.bf16.mxu1 %vm650_vm0, %v649_v0 }
 0x236   : > { %611 = vmatmul.mubr.msk.bf16.vlgmr.msra.gmra.mrb[4].mxu1 %vm250_vm1, %v367_v34 }
 0x301   : > { %v359_v35 = vpop.f32.mrb[0].mxu1 }
 0x302   : > { %v606_v36 = vpop.f32.mrb[1].mxu1 }
 0x303   : > { %v362_v37 = vpop.f32.mrb[2].mxu1 }
 0x304   : > { %v607_v38 = vpop.f32.mrb[3].mxu1 }
 0x309   : > { %v411_v39 = vpop.f32.mrb[4].mxu1 }
 0x30a   : > { %v417_v40 = vmul.f32 0.25, %v411_v39  ;;  %v612_v41 = vpop.f32.mrb[5].mxu1 }
 0x30b   : > { %v414_v42 = vpop.f32.mrb[6].mxu1 }
 0x30c   : > { %v613_v43 = vpop.f32.mrb[7].mxu1  ;;  %v418_v44 = vsel %vm303_vm3, %v417_v40, -1e+09 }
 0x30d   : > { %v419_v45 = vsel %vm305_vm4, %v418_v44, -inf }
 0x30e   : > { %420 = vmax.xlane.f32.xlu0 %v419_v45 }
 0x324   : > { %432 = vrot.lane.b32.xlu0 %v249_v26, %s652_s27 }
 0x39b   : > { %v421_v46 = vpop.xlane.xlu0 %420 }
 0x39c   : > { %v422_v47 = vsub.f32 %v418_v44, %v421_v46 }
 0x39e   : > { %v423_v48 = vmul.f32 1.442695, %v422_v47 }
 0x39f   : > { %v433_v51 = vpop.permute.xlu0 %432 }
 0x3a0   : > { %637 = vpow2.f32 %v423_v48  ;;  %v438_v52 = vsel %vm321_vm5, %v433_v51, 0 }
 0x3a1   : > { %615 = vmatpush3.bf16.msra.mxu0 %v438_v52 }
 0x3aa   : > { %v638_v49 = vpop.eup %637 }
 0x3ab   : > { %v425_v50 = vsel %vm305_vm4, %v638_v49, 0.0 }
 0x3ac   : > { %426 = vadd.xlane.f32.xlu1 %v425_v50 }
 0x439   : > { %v427_v53 = vpop.xlane.xlu1 %426 }
 0x43a   : > { %639 = vrcp.f32 %v427_v53 }
 0x444   : > { %v640_v54 = vpop.eup %639 }
 0x445   : > { %v429_v55 = vmul.f32 %v640_v54, %v638_v49 }
 0x447   : > { %v430_v56 = vpack.c.bf16 %v429_v55, %v429_v55 }
 0x449   : > { %617 = vmatmul.mubr.msk.bf16.vlgmr.msra.gmra.mrb[4].mxu0 %vm305_vm4, %v430_v56 }
 0x51c   : > { %v474_v57 = vpop.f32.mrb[4].mxu0 }
 0x51d   : > { %481 = vrot.lane.b32.xlu0 %v474_v57, %s653_s5  ;;  %v618_v58 = vpop.f32.mrb[5].mxu0 }
 0x51e   : > { %v477_v59 = vpop.f32.mrb[6].mxu0 }
 0x51f   : > { %v619_v60 = vpop.f32.mrb[7].mxu0 }
 0x58f   : > { %v482_v61 = vpop.permute.xlu0 %481 }
 0x590   : > { %v484_v62 = vsel %vm250_vm1, %v359_v35, %v482_v61 }
 0x591   : > { %486 = vst.msk [vmem:[%s240_s8] sm:$0xff] %vm485_vm6, %v484_v62 }
 0x592 PF: > { %s14_s15 = sadd.s32 1, %s647_s15  }
 0x593   : > { %p11_p4 = scmp.ge.s32.totalorder %s14_s15, 4  }
 0x595   :  { %13 = sbr.rel (!%p11_p4) target bundleno = 1 (0x1), region = 75 }

// kernel: transformer_forward.52
= control target key start
LH: loop header
LB: loop body
LE: loop exit
PB: predicated region body
PF: predicated region fallthrough
CT: control target
= control target key end

     0   :  { %vm19_vm0 = vcmask 523264   ;;  %v118_v0 = vmov 0.0   ;;  %vm119_vm1 = vmmov 0   ;;  %vm33_vm2 = vcmask 261120   ;;  %s173_s1 = inlined_call_operand.vmem [shape: f32[32,64], index: 1, kind: input, shape index: {}]   ;;  %s174_s0 = inlined_call_operand.vmem [shape: f32[16,32], index: 0, kind: input, shape index: {}]   ;;  %s175_s2 = inlined_call_operand.vmem [shape: f32[1,64], index: 2, kind: input, shape index: {}]   ;;  %s176_s3 = inlined_call_operand.vmem [shape: f32[16,64], index: 3, kind: output, shape index: {}]  }
   0x1   :  { %108 = vmatprep.subr.bf16.mxu0 %v118_v0  ;;  %v27_v1 = vld [vmem:[%s173_s1] sm:$0xff]  ;;  %v28_v2 = vld [vmem:[%s173_s1 + $0x8] sm:$0xff]  ;;  %v29_v3 = vld [vmem:[%s173_s1 + $0x10] sm:$0xff]  ;;  %112 = vmatprep.mubr.msk.bf16.mxu0 %vm119_vm1, %v118_v0  ;;  %20 = vst.msk [vmem:[#allocation2] sm:$0xff] %vm19_vm0, %v118_v0 }
   0x2   :  { %21 = vst.msk [vmem:[#allocation2 + $0x8] sm:$0xff] %vm19_vm0, %v118_v0  ;;  %v31_v4 = vpack.c.bf16 %v28_v2, %v27_v1  ;;  %v30_v5 = vld [vmem:[%s173_s1 + $0x18] sm:$0xff]  ;;  %v24_v7 = vld [vmem:[%s174_s0] sm:$0xff]  ;;  %v25_v8 = vld [vmem:[%s174_s0 + $0x8] sm:$0xff] }
   0x3   :  { %v32_v6 = vpack.c.bf16 %v30_v5, %v29_v3  ;;  %v26_v9 = vpack.c.bf16 %v25_v8, %v24_v7  ;;  %v104_v18 = vld [vmem:[%s175_s2] ss:$0 sm:$0xff] }
   0x4   :  { %109 = vmatpush3.bf16.msra.mxu0 %v31_v4 }
   0x5   :  { %110 = vmatprep.subr.bf16.mxu0 %v118_v0 }
   0x8   :  { %111 = vmatpush3.bf16.msra.mxu0 %v32_v6  ;;  %v22_v10 = vld [vmem:[#allocation2] sm:$0xff] }
   0x9   :  { %v23_v12 = vld [vmem:[#allocation2 + $0x8] sm:$0xff] }
   0xb   :  { %113 = vmatmul.mubr.msk.bf16.vlgmr.msra.gmra.mrb[0].mxu0 %vm33_vm2, %v26_v9 }
  0xde   :  { %v71_v11 = vpop.f32.mrb[0].mxu0 }
  0xdf   :  { %v78_v13 = vadd.f32 %v71_v11, %v22_v10  ;;  %v114_v14 = vpop.f32.mrb[1].mxu0 }
  0xe0   :  { %v74_v15 = vpop.f32.mrb[2].mxu0 }
  0xe1   :  { %81 = vst.msk [vmem:[#allocation2] sm:$0xff] %vm19_vm0, %v78_v13  ;;  %v79_v16 = vadd.f32 %v74_v15, %v23_v12  ;;  %v115_v17 = vpop.f32.mrb[3].mxu0 }
  0xe3   :  { %82 = vst.msk [vmem:[#allocation2 + $0x8] sm:$0xff] %vm19_vm0, %v79_v16 }
  0xe8   :  { %v86_v19 = vld [vmem:[#allocation2] sm:$0xff] }
  0xe9   :  { %v95_v20 = vadd.f32 %v104_v18, %v86_v19 }
  0xea   :  { %v87_v21 = vld [vmem:[#allocation2 + $0x8] sm:$0xff] }
  0xeb   :  { %97 = vst.msk [vmem:[%s176_s3] sm:$0xff] %vm19_vm0, %v95_v20  ;;  %v96_v22 = vadd.f32 %v104_v18, %v87_v21 }
  0xed   :  { %98 = vst.msk [vmem:[%s176_s3 + $0x8] sm:$0xff] %vm19_vm0, %v96_v22 }

// kernel: transformer_forward.39
= control target key start
LH: loop header
LB: loop body
LE: loop exit
PB: predicated region body
PF: predicated region fallthrough
CT: control target
= control target key end

     0   :  { %v189_v0 = vmov 0.0   ;;  %vm190_vm0 = vmmov 0   ;;  %vm37_vm1 = vcmask 261120   ;;  %vm104_vm2 = vcmask 523264   ;;  %s278_s1 = inlined_call_operand.vmem [shape: f32[32,64], index: 1, kind: input, shape index: {}]   ;;  %s279_s3 = inlined_call_operand.vmem [shape: f32[64,32], index: 3, kind: input, shape index: {}]   ;;  %s280_s0 = inlined_call_operand.vmem [shape: f32[16,32], index: 0, kind: input, shape index: {}]   ;;  %s281_s2 = inlined_call_operand.vmem [shape: f32[1,64], index: 2, kind: input, shape index: {}]   ;;  %s282_s4 = inlined_call_operand.vmem [shape: f32[1,32], index: 4, kind: input, shape index: {}]   ;;  %s283_s5 = inlined_call_operand.vmem [shape: f32[16,32], index: 5, kind: output, shape index: {}]  }
   0x1   :  { %167 = vmatprep.subr.bf16.mxu0 %v189_v0  ;;  %v24_v1 = vld [vmem:[%s278_s1] sm:$0xff]  ;;  %v25_v2 = vld [vmem:[%s278_s1 + $0x8] sm:$0xff]  ;;  %v26_v3 = vld [vmem:[%s278_s1 + $0x10] sm:$0xff]  ;;  %171 = vmatprep.mubr.msk.bf16.mxu0 %vm190_vm0, %v189_v0 }
   0x2   :  { %v28_v4 = vpack.c.bf16 %v25_v2, %v24_v1  ;;  %v27_v5 = vld [vmem:[%s278_s1 + $0x18] sm:$0xff]  ;;  %175 = vmatprep.subr.bf16.mxu1 %v189_v0  ;;  %183 = vmatprep.mubr.msk.bf16.mxu1 %vm190_vm0, %v189_v0  ;;  %v85_v6 = vld [vmem:[%s279_s3] sm:$0xff]  ;;  %v86_v7 = vld [vmem:[%s279_s3 + $0x8] sm:$0xff] }
   0x3   :  { %v87_v8 = vld [vmem:[%s279_s3 + $0x10] sm:$0xff]  ;;  %v29_v9 = vpack.c.bf16 %v27_v5, %v26_v3  ;;  %v21_v10 = vld [vmem:[%s280_s0] sm:$0xff]  ;;  %v22_v11 = vld [vmem:[%s280_s0 + $0x8] sm:$0xff]  ;;  %v93_v12 = vpack.c.bf16 %v86_v7, %v85_v6 }
   0x4   :  { %168 = vmatpush3.bf16.msra.mxu0 %v28_v4  ;;  %v88_v13 = vld [vmem:[%s279_s3 + $0x18] sm:$0xff]  ;;  %v23_v15 = vpack.c.bf16 %v22_v11, %v21_v10  ;;  %v89_v16 = vld [vmem:[%s279_s3 + $0x20] sm:$0xff]  ;;  %v90_v17 = vld [vmem:[%s279_s3 + $0x28] sm:$0xff] }
   0x5   :  { %169 = vmatprep.subr.bf16.mxu0 %v189_v0  ;;  %176 = vmatpush3.bf16.msra.mxu1 %v93_v12  ;;  %v94_v14 = vpack.c.bf16 %v88_v13, %v87_v8  ;;  %v95_v18 = vpack.c.bf16 %v90_v17, %v89_v16  ;;  %v91_v19 = vld [vmem:[%s279_s3 + $0x30] sm:$0xff]  ;;  %v92_v20 = vld [vmem:[%s279_s3 + $0x38] sm:$0xff]  ;;  %v155_v22 = vld [vmem:[%s281_s2] ss:$0 sm:$0xff] }
   0x6   :  { %177 = vmatprep.subr.bf16.mxu1 %v189_v0  ;;  %v96_v21 = vpack.c.bf16 %v92_v20, %v91_v19  ;;  %v157_v32 = vld [vmem:[%s282_s4] ss:$0 sm:$0xff] }
   0x8   :  { %170 = vmatpush3.bf16.msra.mxu0 %v29_v9 }
   0x9   :  { %178 = vmatpush3.bf16.msra.mxu1 %v94_v14 }
   0xa   :  { %179 = vmatprep.subr.bf16.mxu1 %v189_v0 }
   0xb   :  { %172 = vmatmul.mubr.msk.bf16.vlgmr.msra.gmra.mrb[0].mxu0 %vm37_vm1, %v23_v15 }
   0xd   :  { %180 = vmatpush3.bf16.msra.mxu1 %v95_v18 }
   0xe   :  { %181 = vmatprep.subr.bf16.mxu1 %v189_v0 }
  0x11   :  { %182 = vmatpush3.bf16.msra.mxu1 %v96_v21 }
  0xde   :  { %v75_v23 = vpop.f32.mrb[0].mxu0 }
  0xdf   :  { %v76_v24 = vadd.f32 %v155_v22, %v75_v23  ;;  %v173_v25 = vpop.f32.mrb[1].mxu0 }
  0xe0   :  { %v78_v26 = vpop.f32.mrb[2].mxu0 }
  0xe1   :  { %v79_v27 = vadd.f32 %v155_v22, %v78_v26  ;;  %v174_v28 = vpop.f32.mrb[3].mxu0  ;;  %v82_v29 = vmax.f32 %v76_v24, 0.0 }
  0xe3   :  { %v83_v30 = vmax.f32 %v79_v27, 0.0 }
  0xe5   :  { %v84_v31 = vpack.c.bf16 %v83_v30, %v82_v29 }
  0xe7   :  { %184 = vmatmul.mubr.msk.bf16.vlgmr.msra.gmra.mrb[0].mxu1 %vm104_vm2, %v84_v31 }
 0x1ba   :  { %v142_v33 = vpop.f32.mrb[0].mxu1 }
 0x1bb   :  { %v143_v34 = vadd.f32 %v157_v32, %v142_v33  ;;  %v185_v35 = vpop.f32.mrb[1].mxu1 }
 0x1bc   :  { %v145_v36 = vpop.f32.mrb[2].mxu1 }
 0x1bd   :  { %149 = vst.msk [vmem:[%s283_s5] sm:$0xff] %vm37_vm1, %v143_v34  ;;  %v146_v37 = vadd.f32 %v157_v32, %v145_v36  ;;  %v186_v38 = vpop.f32.mrb[3].mxu1 }
 0x1bf   :  { %150 = vst.msk [vmem:[%s283_s5 + $0x8] sm:$0xff] %vm37_vm1, %v146_v37 }

// kernel: transformer_forward.69
= control target key start
LH: loop header
LB: loop body
LE: loop exit
PB: predicated region body
PF: predicated region fallthrough
CT: control target
= control target key end

     0   :  { %v158_v3 = vmov 0.0   ;;  %vm159_vm0 = vmmov 0   ;;  %vm20_vm1 = vcmask 408576   ;;  %s222_s0 = inlined_call_operand.vmem [shape: f32[16,32], index: 0, kind: input, shape index: {}]   ;;  %s223_s1 = inlined_call_operand.vmem [shape: f32[32,50], index: 1, kind: input, shape index: {}]   ;;  %s224_s2 = inlined_call_operand.vmem [shape: f32[1,50], index: 2, kind: input, shape index: {}]   ;;  %s225_s3 = inlined_call_operand.hbm [shape: f32[16,50], index: 3, kind: output, shape index: {}]  }
   0x1   :  { %v28_v0 = vld [vmem:[%s223_s1] sm:$0xff]  ;;  %v29_v1 = vld [vmem:[%s223_s1 + $0x8] sm:$0xff]  ;;  %v30_v2 = vld [vmem:[%s223_s1 + $0x10] sm:$0xff]  ;;  %121 = vmatprep.subr.bf16.mxu0 %v158_v3  ;;  %125 = vmatprep.mubr.msk.bf16.mxu0 %vm159_vm0, %v158_v3  ;;  %21 = vst.msk [vmem:[#allocation2] sm:$0xff] %vm20_vm1, %v158_v3 }
   0x2   :  { %v32_v4 = vpack.c.bf16 %v29_v1, %v28_v0  ;;  %v31_v5 = vld [vmem:[%s223_s1 + $0x18] sm:$0xff]  ;;  %22 = vst.msk [vmem:[#allocation2 + $0x8] sm:$0xff] %vm20_vm1, %v158_v3 }
   0x3   :  { %8 = vsyncpa [#allocation4], 0  ;;  %v33_v6 = vpack.c.bf16 %v31_v5, %v30_v2  ;;  %v25_v7 = vld [vmem:[%s222_s0] sm:$0xff]  ;;  %v26_v8 = vld [vmem:[%s222_s0 + $0x8] sm:$0xff]  ;;  %vm34_vm2 = vcmask 261120   ;;  %s160_s0 = smov [#allocation3]  }
   0x4   :  { %122 = vmatpush3.bf16.msra.mxu0 %v32_v4  ;;  %v27_v9 = vpack.c.bf16 %v26_v8, %v25_v7  ;;  %v117_v18 = vld [vmem:[%s224_s2] ss:$0 sm:$0xff]  ;;  %s105_s25 = sshll.u32 %s160_s0, 4  ;;  %s106_s25 = int_to_ptr.vmem [resolvable:$true] %s105_s25 }
   0x5   :  { %123 = vmatprep.subr.bf16.mxu0 %v158_v3  ;;  %s134_s26 = scalar_lea.vmem %s106_s25, 256  ;;  %p139_p1 = scmp.lt.s32.totalorder %s106_s25, %s106_s25 }
   0x6   :  { %p135_p0 = scmp.ne.s32.totalorder %s106_s25, %s134_s26  ;;  %p140_p2 = scmp.lt.s32.totalorder %s134_s26, %s134_s26 }
   0x8   :  { %124 = vmatpush3.bf16.msra.mxu0 %v33_v6  ;;  %v23_v10 = vld [vmem:[#allocation2] sm:$0xff]  ;;  %p141_p3 = por %p140_p2, %p139_p1 }
   0x9   :  { %v24_v12 = vld [vmem:[#allocation2 + $0x8] sm:$0xff] }
   0xa   :  { %p142_p4 = pnand %p141_p3, %p135_p0 }
   0xb   :  { %126 = vmatmul.mubr.msk.bf16.vlgmr.msra.gmra.mrb[0].mxu0 %vm34_vm2, %v27_v9 }
  0xde   :  { %v72_v11 = vpop.f32.mrb[0].mxu0 }
  0xdf   :  { %v79_v13 = vadd.f32 %v72_v11, %v23_v10  ;;  %v127_v14 = vpop.f32.mrb[1].mxu0 }
  0xe0   :  { %v75_v15 = vpop.f32.mrb[2].mxu0 }
  0xe1   :  { %82 = vst.msk [vmem:[#allocation2] sm:$0xff] %vm20_vm1, %v79_v13  ;;  %v80_v16 = vadd.f32 %v75_v15, %v24_v12  ;;  %v128_v17 = vpop.f32.mrb[3].mxu0 }
  0xe3   :  { %83 = vst.msk [vmem:[#allocation2 + $0x8] sm:$0xff] %vm20_vm1, %v80_v16 }
  0xe8   :  { %v87_v19 = vld [vmem:[#allocation2] sm:$0xff] }
  0xe9   :  { %v96_v20 = vadd.f32 %v117_v18, %v87_v19 }
  0xea   :  { %v88_v21 = vld [vmem:[#allocation2 + $0x8] sm:$0xff] }
  0xeb   :  { %v97_v22 = vadd.f32 %v117_v18, %v88_v21  ;;  %98 = vst.msk [vmem:[#allocation3] sm:$0xff] %vm20_vm1, %v96_v20 }
  0xed   :  { %99 = vst.msk [vmem:[#allocation3 + $0x8] sm:$0xff] %vm20_vm1, %v97_v22 }
  0xee   :  { %145 = shalt.err (!%p142_p4)
}
  0xef   :  { %s146_s28 = scalar_lea.hbm %s225_s3, 256 }
  0xf0   :  { %p147_p5 = scmp.ne.s32.totalorder %s225_s3, %s146_s28  ;;  %p150_p6 = scmp.lt.u32.totalorder %s146_s28, %s225_s3 }
  0xf2   :  { %p152_p7 = pnand %p150_p6, %p147_p5 }
  0xf4   :  { %155 = shalt.err (!%p152_p7)
}
  0xf5   :  { %s161_s6 = smov 128   ;;  %s162_s7 = smov 8  }
  0xf6   :  { %111 = dma.vmem_to_hbm [thread:$0]  %s106_s25, 256, %s225_s3, [#allocation4], %s161_s6, %s161_s6, %s162_s7  }
  0xf7   :  { %156 = dma.done.wait [#allocation4], 256  }
  0xf8   :  { %157 = vsyncadd [#allocation4], 4294967040 }
  0xf9   :  { %115 = vsyncpa [#allocation4], 1 }

// kernel: transformer_forward.48
= control target key start
LH: loop header
LB: loop body
LE: loop exit
PB: predicated region body
PF: predicated region fallthrough
CT: control target
= control target key end

     0   :  { %s678_s15 = smov 0   ;;  %s733_s0 = inlined_call_operand.vmem [shape: f32[2,8,32], index: 0, kind: input, shape index: {}]   ;;  %s734_s1 = inlined_call_operand.vmem [shape: f32[2,8,32], index: 1, kind: input, shape index: {}]   ;;  %s735_s2 = inlined_call_operand.vmem [shape: f32[2,8,32], index: 2, kind: input, shape index: {}]   ;;  %s736_s3 = inlined_call_operand.vmem [shape: f32[2,8,8], index: 3, kind: input, shape index: {}]   ;;  %s737_s4 = inlined_call_operand.vmem [shape: f32[2,8,32], index: 4, kind: output, shape index: {}]  }
   0x1 LB: > { %s573_s16 = sadd.s32 4294967295, %s647_s15   ;;  %p577_p0 = scmp.ge.s32.totalorder %s647_s15, 1  ;;  %s647_s15 = sphi %s678_s15, %s14_s15  }
   0x2   : > { %p188_p1 = scmp.lt.s32.totalorder %s647_s15, 3 }
   0x4   : > { %p189_p2 = pnand %p577_p0, %p188_p1 }
   0x5   : > { %p224_p3 = scmp.lt.s32.totalorder (!%p189_p2), %s573_s16, 1  ;;  %v649_v0 = vmov (!%p189_p2), 0.0   ;;  %vm650_vm0 = vmmov (!%p189_p2), 0   ;;  %vm253_vm1 = vcmask (!%p189_p2), 130048   ;;  %vm302_vm3 = vcmask (!%p189_p2), 64512   ;;  %s651_s27 = smov (!%p189_p2), 112  }
   0x6   : > { %192 = sbr.rel (%p189_p2) target bundleno = 1426 (0x592), region = 36  ;;  %597 = vmatprep.subr.bf16.mxu0 (!%p189_p2), %v649_v0  ;;  %599 = vmatprep.mubr.msk.bf16.mxu0 (!%p189_p2), %vm650_vm0, %v649_v0  ;;  %vm318_vm4 = vcmask (!%p189_p2), 1043456   ;;  %s652_s5 = smov (!%p189_p2), 16   ;;  %vm482_vm5 = vcmask (!%p189_p2), 261120  }
   0x7   : > { %603 = vmatprep.subr.bf16.mxu1 (!%p189_p2), %v649_v0  ;;  %605 = vmatprep.mubr.msk.bf16.mxu1 (!%p189_p2), %vm650_vm0, %v649_v0 }
   0xd   : > { %s739_s16 = smov (!%p224_p3, %s573_s16), 1 }
   0xe   : > { %s688_s17 = sshll.u32 %s739_s16, 3 }
   0xf   : > { %s231_s20 = scalar_lea.vmem %s734_s1, %s688_s17  ;;  %s227_s23 = scalar_lea.vmem %s733_s0, %s688_s17 }
  0x10   : > { %v246_v1 = vld [vmem:[%s231_s20] sm:$0xff]  ;;  %s239_s26 = scalar_lea.vmem %s736_s3, %s688_s17  ;;  %s235_s30 = scalar_lea.vmem %s735_s2, %s688_s17 }
  0x11   : > { %v251_v2 = vpack.c.bf16 %v246_v1, %v246_v1  ;;  %v245_v4 = vld [vmem:[%s227_s23] sm:$0xff]  ;;  %s243_s8 = scalar_lea.vmem %s737_s4, %s688_s17 }
  0x12   : > { %v250_v5 = vpack.c.bf16 %v245_v4, %v245_v4  ;;  %v248_v6 = vld [vmem:[%s239_s26] sm:$0xff] }
  0x13   : > { %v258_v3 = vsel %vm253_vm1, %v251_v2, 0  ;;  %vm249_vm2 = vcmp.gt.f32.partialorder %v248_v6, 0.5  ;;  %366 = vrot.lane.b32.xlu1 %v251_v2, %s651_s27  ;;  %v247_v19 = vld [vmem:[%s235_s30] sm:$0xff] }
  0x14   : > { %598 = vmatpush3.bf16.xpose.msra.mxu0 %v258_v3  ;;  %v252_v20 = vpack.c.bf16 %v247_v19, %v247_v19 }
  0x15   : > { %615 = vmatprep.subr.bf16.mxu0 %v649_v0 }
  0x16   : > { %v320_v21 = vsel %vm318_vm4, %v252_v20, 0 }
  0x17   : > { %363 = vrot.lane.b32.xlu1 %v250_v5, %s651_s27  ;;  %604 = vmatpush3.bf16.msra.mxu1 %v320_v21 }
  0x18   : > { %609 = vmatprep.subr.bf16.mxu1 %v649_v0 }
  0x1b   : > { %600 = vmatmul.mubr.msk.bf16.vlgmr.msra.gmra.mrb[0].mxu0 %vm253_vm1, %v250_v5 }
  0x1c   : > { %617 = vmatprep.mubr.msk.bf16.mxu0 %vm650_vm0, %v649_v0 }
  0x85   : > { %v367_v24 = vpop.permute.xlu1 %366 }
  0x86   : > { %v372_v26 = vsel %vm253_vm1, %v367_v24, 0 }
  0x89   : > { %v364_v28 = vpop.permute.xlu1 %363 }
  0xee   : > { %v294_v7 = vpop.f32.mrb[0].mxu0 }
  0xef   : > { %v300_v8 = vmul.f32 0.25, %v294_v7  ;;  %v601_v9 = vpop.f32.mrb[1].mxu0 }
  0xf0   : > { %v297_v10 = vpop.f32.mrb[2].mxu0 }
  0xf1   : > { %v602_v11 = vpop.f32.mrb[3].mxu0  ;;  %v301_v12 = vsel %vm249_vm2, %v300_v8, -1e+09 }
  0xf2   : > { %v303_v13 = vsel %vm302_vm3, %v301_v12, -inf }
  0xf3   : > { %304 = vmax.xlane.f32.xlu0 %v303_v13 }
 0x180   : > { %v305_v14 = vpop.xlane.xlu0 %304 }
 0x181   : > { %v306_v15 = vsub.f32 %v301_v12, %v305_v14 }
 0x183   : > { %v307_v16 = vmul.f32 1.442695, %v306_v15 }
 0x185   : > { %633 = vpow2.f32 %v307_v16 }
 0x18f   : > { %v634_v17 = vpop.eup %633 }
 0x190   : > { %v309_v18 = vsel %vm302_vm3, %v634_v17, 0.0 }
 0x191   : > { %310 = vadd.xlane.f32.xlu0 %v309_v18 }
 0x21e   : > { %v311_v22 = vpop.xlane.xlu0 %310 }
 0x21f   : > { %635 = vrcp.f32 %v311_v22 }
 0x229   : > { %v636_v23 = vpop.eup %635 }
 0x22a   : > { %v313_v25 = vmul.f32 %v636_v23, %v634_v17 }
 0x22c   : > { %v314_v27 = vpack.c.bf16 %v313_v25, %v313_v25 }
 0x22e   : > { %606 = vmatmul.mubr.msk.bf16.vlgmr.msra.gmra.mrb[0].mxu1 %vm302_vm3, %v314_v27 }
 0x22f   : > { %610 = vmatpush3.bf16.xpose.msra.mxu1 %v372_v26  ;;  %611 = vmatprep.mubr.msk.bf16.mxu1 %vm650_vm0, %v649_v0 }
 0x236   : > { %612 = vmatmul.mubr.msk.bf16.vlgmr.msra.gmra.mrb[4].mxu1 %vm253_vm1, %v364_v28 }
 0x301   : > { %v356_v29 = vpop.f32.mrb[0].mxu1 }
 0x302   : > { %v607_v30 = vpop.f32.mrb[1].mxu1 }
 0x303   : > { %v359_v31 = vpop.f32.mrb[2].mxu1 }
 0x304   : > { %v608_v32 = vpop.f32.mrb[3].mxu1 }
 0x309   : > { %v408_v33 = vpop.f32.mrb[4].mxu1 }
 0x30a   : > { %v414_v34 = vmul.f32 0.25, %v408_v33  ;;  %v613_v35 = vpop.f32.mrb[5].mxu1 }
 0x30b   : > { %v411_v36 = vpop.f32.mrb[6].mxu1 }
 0x30c   : > { %v614_v37 = vpop.f32.mrb[7].mxu1  ;;  %v415_v38 = vsel %vm249_vm2, %v414_v34, -1e+09 }
 0x30d   : > { %v416_v39 = vsel %vm302_vm3, %v415_v38, -inf }
 0x30e   : > { %417 = vmax.xlane.f32.xlu0 %v416_v39 }
 0x324   : > { %429 = vrot.lane.b32.xlu0 %v252_v20, %s651_s27 }
 0x39b   : > { %v418_v40 = vpop.xlane.xlu0 %417 }
 0x39c   : > { %v419_v41 = vsub.f32 %v415_v38, %v418_v40 }
 0x39e   : > { %v420_v42 = vmul.f32 1.442695, %v419_v41 }
 0x39f   : > { %v430_v45 = vpop.permute.xlu0 %429 }
 0x3a0   : > { %637 = vpow2.f32 %v420_v42  ;;  %v435_v46 = vsel %vm318_vm4, %v430_v45, 0 }
 0x3a1   : > { %616 = vmatpush3.bf16.msra.mxu0 %v435_v46 }
 0x3aa   : > { %v638_v43 = vpop.eup %637 }
 0x3ab   : > { %v422_v44 = vsel %vm302_vm3, %v638_v43, 0.0 }
 0x3ac   : > { %423 = vadd.xlane.f32.xlu1 %v422_v44 }
 0x439   : > { %v424_v47 = vpop.xlane.xlu1 %423 }
 0x43a   : > { %639 = vrcp.f32 %v424_v47 }
 0x444   : > { %v640_v48 = vpop.eup %639 }
 0x445   : > { %v426_v49 = vmul.f32 %v640_v48, %v638_v43 }
 0x447   : > { %v427_v50 = vpack.c.bf16 %v426_v49, %v426_v49 }
 0x449   : > { %618 = vmatmul.mubr.msk.bf16.vlgmr.msra.gmra.mrb[4].mxu0 %vm302_vm3, %v427_v50 }
 0x51c   : > { %v471_v51 = vpop.f32.mrb[4].mxu0 }
 0x51d   : > { %478 = vrot.lane.b32.xlu0 %v471_v51, %s652_s5  ;;  %v619_v52 = vpop.f32.mrb[5].mxu0 }
 0x51e   : > { %v474_v53 = vpop.f32.mrb[6].mxu0 }
 0x51f   : > { %v620_v54 = vpop.f32.mrb[7].mxu0 }
 0x58f   : > { %v479_v55 = vpop.permute.xlu0 %478 }
 0x590   : > { %v481_v56 = vsel %vm253_vm1, %v356_v29, %v479_v55 }
 0x591   : > { %483 = vst.msk [vmem:[%s243_s8] sm:$0xff] %vm482_vm5, %v481_v56 }
 0x592 PF: > { %s14_s15 = sadd.s32 1, %s647_s15  }
 0x593   : > { %p11_p4 = scmp.ge.s32.totalorder %s14_s15, 4  }
 0x595   :  { %13 = sbr.rel (!%p11_p4) target bundleno = 1 (0x1), region = 75 }

</bundles_post_ra>
